<compile_context>
chip_gen: v5e
topology: v5e:2x2
jax: 0.10.0
libtpu: 0.0.40
codegen_flags: <defaults>
</compile_context>

<pallas_src>
import functools
import math

import numpy as np
import jax
import jax.numpy as jnp
from jax.experimental import pallas as pl
from jax.experimental.pallas import tpu as pltpu


LANE = 128
_EPS = 1e-5


# --------------------------------------------------------------------------
# Small host-side helpers
# --------------------------------------------------------------------------
def _round_up(x, m):
    return ((x + m - 1) // m) * m


def _expansion_matrices(head_num, head_dim):
    """Constant 0/1 matrices expressing per-head broadcasts/reductions as matmuls."""
    H, d = head_num, head_dim
    hid, big = H * d, H * d * d
    h_hid = np.arange(hid) // d          # head index of a (h, a) column
    a_hid = np.arange(hid) % d           # within-head index of a (h, a) column
    h_big = np.arange(big) // (d * d)    # head index of a (h, a, p) column
    a_big = (np.arange(big) // d) % d    # v/row index of a (h, a, p) column
    p_big = np.arange(big) % d           # k/col index of a (h, a, p) column

    e_h2hid = (np.arange(H)[:, None] == h_hid[None, :]).astype(np.float32)
    e_h2big = (np.arange(H)[:, None] == h_big[None, :]).astype(np.float32)
    e_v2big = ((h_hid[:, None] == h_big[None, :]) &
               (a_hid[:, None] == a_big[None, :])).astype(np.float32)
    e_k2big = ((h_hid[:, None] == h_big[None, :]) &
               (a_hid[:, None] == p_big[None, :])).astype(np.float32)
    return (jnp.asarray(e_h2hid), jnp.asarray(e_v2big),
            jnp.asarray(e_k2big), jnp.asarray(e_h2big))


def _causal_conv_band(conv_w, width):
    """(width, width) banded matrix B with (x @ B)[i] == causal_conv1d(x)[i]."""
    K = conv_w.shape[0]
    j = np.arange(width)[:, None]   # source position
    i = np.arange(width)[None, :]   # output position
    t = j - i + (K - 1)
    valid = jnp.asarray((t >= 0) & (t < K))
    taps = jnp.asarray(conv_w)[np.clip(t, 0, K - 1)]
    return jnp.where(valid, taps, 0.0).astype(jnp.float32)


def _pad_cols(w, b, multiple=LANE):
    """Zero-pad the output-column axis of a fused (K, N) weight + (1, N) bias."""
    n = w.shape[1]
    n_pad = _round_up(n, multiple)
    if n_pad != n:
        w = jnp.pad(w, ((0, 0), (0, n_pad - n)))
        b = jnp.pad(b, ((0, 0), (0, n_pad - n)))
    return w, b


# --------------------------------------------------------------------------
# Kernel
# --------------------------------------------------------------------------
def _mlstm_kernel(head_dim, head_num, pD, D, mxu_dtype, *refs):
    (seq_ref, c_ref, n_ref, m_ref,
     ln_w, ln_b, w_nf, b_nf, conv_band, conv_b,
     w_cf, b_cf, w_tf, b_tf, gn_w, gn_b, w_down, b_down,
     e_h2hid, e_v2big, e_k2big, e_h2big,
     small_ref, c_out_ref) = refs

    f32 = jnp.float32
    H, d = head_num, head_dim
    hid = H * d
    inv_sqrt_d = 1.0 / math.sqrt(d)
    inv_d = 1.0 / d
    # Fast EUP reciprocal only off the bit-parity (f32) path.
    approx = np.dtype(mxu_dtype) != np.dtype(np.float32)

    def mm(a, b):
        # f32 activation cast to the MXU dtype; weights already stored in it.
        return jnp.dot(a.astype(mxu_dtype), b, preferred_element_type=f32)

    def mm_t(a, b):
        # a @ b.T : segmented reductions over the lane axis.
        return jax.lax.dot_general(
            a.astype(mxu_dtype), b,
            dimension_numbers=(((1,), (1,)), ((), ())),
            preferred_element_type=f32)

    def sigmoid(x):
        # exp + reciprocal both route through the EUP slot.
        return pl.reciprocal(1.0 + jnp.exp(-x), approx=approx)

    E_hh = e_h2hid[...]   # (H,   hid) : h      -> (h, a)
    E_v = e_v2big[...]    # (hid, big) : (h, a) -> (h, a, p)   (repeat over p)
    E_k = e_k2big[...]    # (hid, big) : (h, p) -> (h, a, p)   (repeat over a)
    E_hb = e_h2big[...]   # (H,   big) : h      -> (h, a, p)

    seq = seq_ref[...].astype(f32)

    # ---- LayerNorm(input_size) ----
    mu = jnp.mean(seq, axis=-1, keepdims=True)
    xc0 = seq - mu
    var = jnp.mean(xc0 * xc0, axis=-1, keepdims=True)
    x_n = xc0 * jax.lax.rsqrt(var + _EPS) * ln_w[...] + ln_b[...]

    # ---- fused up projections: [x_t | r_t] ----
    nf = mm(x_n, w_nf[...]) + b_nf[...]
    x_t = nf[:, :pD]
    r_t = nf[:, pD:pD + hid]

    # ---- causal conv1d (banded matmul) + SiLU ----
    x_cv = mm(x_t, conv_band[...]) + conv_b[...]
    x_c = x_cv * sigmoid(x_cv)

    # ---- fused projections from x_c: [q | k | skip | i | f] ----
    cf = mm(x_c, w_cf[...]) + b_cf[...]
    q_t = cf[:, :hid]
    k_t = cf[:, hid:2 * hid] * inv_sqrt_d
    skip = cf[:, 2 * hid:3 * hid]
    i_pre = cf[:, 3 * hid:3 * hid + H]
    f_pre = cf[:, 3 * hid + H:3 * hid + 2 * H]

    # ---- fused projections from x_t: [v | o] ----
    tf_p = mm(x_t, w_tf[...]) + b_tf[...]
    v_t = tf_p[:, :hid]
    o_pre = tf_p[:, hid:2 * hid]

    # ---- stabilized exponential gating (f32 VPU/EUP) ----
    m_prev = m_ref[...].astype(f32)
    m_t = jnp.maximum(f_pre + m_prev, i_pre)
    i_g = jnp.exp(i_pre - m_t)
    f_g = jnp.exp(f_pre - m_t + m_prev)
    o_g = sigmoid(o_pre)

    # ---- per-head broadcasts via indicator matmuls (stays 2-D) ----
    i_hid = mm(i_g, E_hh)      # (TB, hid)
    f_hid = mm(f_g, E_hh)      # (TB, hid)
    f_big = mm(f_g, E_hb)      # (TB, big)  direct H -> big broadcast
    k_big = mm(k_t, E_k)       # (TB, big)
    q_big = mm(q_t, E_k)       # (TB, big)

    # ---- covariance / normalizer state update (i_big eliminated) ----
    c_prev = c_ref[...].astype(f32)
    n_prev = n_ref[...].astype(f32)
    c_t = f_big * c_prev + mm(i_hid * v_t, E_v) * k_big
    n_t = f_hid * n_prev + i_hid * k_t

    # ---- memory readout; divide at per-head granularity ----
    h_num = mm_t(c_t * q_big, E_v)                      # sum over p -> (TB, hid)
    den_h = jnp.maximum(mm_t(n_t * q_t, E_hh), 1.0)     # sum over d -> (TB, H)
    inv_den_h = pl.reciprocal(den_h, approx=approx)
    h_t = o_g * h_num * mm(inv_den_h, E_hh)

    # ---- GroupNorm(head_num, hid_dim); rsqrt at per-head granularity ----
    mean_h = mm_t(h_t, E_hh) * inv_d                    # (TB, H)
    h_c = h_t - mm(mean_h, E_hh)
    var_h = mm_t(h_c * h_c, E_hh) * inv_d               # (TB, H)
    rstd_h = jax.lax.rsqrt(var_h + _EPS)
    h_norm = h_c * mm(rstd_h, E_hh) * gn_w[...] + gn_b[...]

    # ---- skip connection, SiLU(r) gating, down projection, residual ----
    gated = (h_norm + skip) * (r_t * sigmoid(r_t))
    out = mm(gated, w_down[...]) + b_down[...] + seq

    # ---- lane-dense packed writeback of the small outputs ----
    small_ref[:, :D] = out.astype(small_ref.dtype)
    small_ref[:, D:D + hid] = n_t.astype(small_ref.dtype)
    small_ref[:, D + hid:D + hid + H] = m_t.astype(small_ref.dtype)
    c_out_ref[...] = c_t.astype(c_out_ref.dtype)


# --------------------------------------------------------------------------
# Wrapper
# --------------------------------------------------------------------------
def mlstm_forward(params, seq, c_tm1, n_tm1, m_tm1, *, mxu_dtype=jnp.bfloat16):
    """Single-step mLSTM forward as one fused Pallas TPU kernel.

    mxu_dtype: dtype of the MXU (matmul) operands.  bfloat16 (default) runs the
    MXU at full rate on v5e/v6e/v7x; float32 gives bit-parity with a float32
    reference.  Element-wise/gating math and the recurrent state are float32
    in both modes.
    """
    B, D = seq.shape
    H = params["w_i"].shape[1]
    hid = params["w_q"].shape[1]
    d = hid // H
    big = H * d * d
    pD = params["w_ul"].shape[1]

    f32 = jnp.float32
    mxu_dtype = np.dtype(mxu_dtype)

    def row(v):
        return jnp.asarray(v, f32).reshape(1, -1)

    def mxu(w):
        return jnp.asarray(w, f32).astype(mxu_dtype)

    # ---- fused weight blocks (wide matmuls instead of many narrow ones) ----
    w_nf, b_nf = _pad_cols(
        jnp.concatenate([params["w_ul"], params["w_ur"]], axis=1),
        jnp.concatenate([params["b_ul"], params["b_ur"]]).reshape(1, -1))
    w_cf, b_cf = _pad_cols(
        jnp.concatenate([params["w_q"], params["w_k"], params["w_skip"],
                         params["w_i"], params["w_f"]], axis=1),
        jnp.concatenate([params["b_q"], params["b_k"], jnp.zeros((hid,), f32),
                         params["b_i"], params["b_f"]]).reshape(1, -1))
    w_tf, b_tf = _pad_cols(
        jnp.concatenate([params["w_v"], params["w_o"]], axis=1),
        jnp.concatenate([params["b_v"], params["b_o"]]).reshape(1, -1))

    conv_band = _causal_conv_band(params["conv_w"], pD)
    conv_bias = jnp.full((1, pD), params["conv_b"], f32)
    e_h2hid, e_v2big, e_k2big, e_h2big = _expansion_matrices(H, d)

    weights = [
        row(params["ln_w"]), row(params["ln_b"]),
        mxu(w_nf), b_nf.astype(f32),
        mxu(conv_band), conv_bias,
        mxu(w_cf), b_cf.astype(f32),
        mxu(w_tf), b_tf.astype(f32),
        row(params["gn_w"]), row(params["gn_b"]),
        mxu(params["w_down"]), row(params["b_down"]),
        mxu(e_h2hid), mxu(e_v2big), mxu(e_k2big), mxu(e_h2big),
    ]
    weight_bytes = sum(int(np.prod(w.shape)) * w.dtype.itemsize for w in weights)

    # ---- generation-aware batch tiling / VMEM budget ----
    # Budget below v7x's 64 MiB physical VMEM (well inside v5e/v6e's 128 MiB);
    # guarantee >= 2 grid programs when the batch allows (v7x has 2 TCs).
    Wsm = _round_up(D + hid + H, LANE)              # packed small-output width
    bytes_per_row = 4 * (2 * (D + big + hid + H)        # double-buffered inputs
                         + 2 * (Wsm + big)              # double-buffered outputs
                         + 8 * big + 14 * hid + 8 * pD + 4 * D)  # f32 temporaries
    VMEM_BUDGET = 56 * 1024 * 1024
    avail = VMEM_BUDGET - 2 * weight_bytes - (2 << 20)
    tb_fit = max(8, (avail // bytes_per_row) // 8 * 8)
    Bp8 = _round_up(B, 8)
    tb_two = _round_up((Bp8 + 1) // 2, 8)
    TB = int(max(8, min(512, tb_fit, tb_two)))
    Bp = _round_up(B, TB)

    # Flatten the recurrent state (free row-major reshapes, no transposes).
    seq_f = seq.astype(f32)
    c_flat = c_tm1.reshape(B, big).astype(f32)
    n_flat = n_tm1.reshape(B, hid).astype(f32)
    m_flat = m_tm1.astype(f32)
    if Bp != B:
        pad = ((0, Bp - B), (0, 0))
        seq_f = jnp.pad(seq_f, pad)
        c_flat = jnp.pad(c_flat, pad)
        n_flat = jnp.pad(n_flat, pad)
        m_flat = jnp.pad(m_flat, pad)

    def bspec(last):
        return pl.BlockSpec((TB, last), lambda b: (b, 0))

    def wspec(arr):
        # Constant index map -> weight block stays resident across the grid.
        return pl.BlockSpec(arr.shape, lambda b: (0, 0))

    in_specs = ([bspec(D), bspec(big), bspec(hid), bspec(H)]
                + [wspec(w) for w in weights])
    out_specs = (bspec(Wsm), bspec(big))
    out_shape = (jax.ShapeDtypeStruct((Bp, Wsm), f32),
                 jax.ShapeDtypeStruct((Bp, big), f32))

    # Advisory cost estimate for XLA's scheduler.
    mac_cols = (D * (pD + hid) + pD * pD + pD * (3 * hid + 2 * H)
                + pD * 2 * hid + 2 * H * hid + H * big + 4 * hid * big
                + 7 * H * hid + hid * D)
    cost = pl.CostEstimate(
        flops=int(2 * Bp * mac_cols),
        transcendentals=int(Bp * (2 * pD + 3 * hid + 6 * H)),
        bytes_accessed=int(weight_bytes + 8 * Bp * (D + big + hid + H)))

    kernel = functools.partial(_mlstm_kernel, d, H, pD, D, mxu_dtype)
    small, c_new = pl.pallas_call(
        kernel,
        out_shape=out_shape,
        grid=(Bp // TB,),
        in_specs=in_specs,
        out_specs=out_specs,
        input_output_aliases={1: 1},   # update the c state in place (decode loops)
        compiler_params=pltpu.CompilerParams(
            dimension_semantics=("parallel",),
            vmem_limit_bytes=VMEM_BUDGET),
        cost_estimate=cost,
    )(seq_f, c_flat, n_flat, m_flat, *weights)

    out = small[:B, :D].astype(seq.dtype)
    n_t = small[:B, D:D + hid].reshape(B, H, d)
    m_t = small[:B, D + hid:D + hid + H]
    c_t = c_new[:B].reshape(B, H, d, d)
    return out, (c_t, n_t, m_t)


# --------------------------------------------------------------------------
# Pure-JAX reference (mirrors the PyTorch forward literally)
# --------------------------------------------------------------------------
def mlstm_reference(params, seq, c_tm1, n_tm1, m_tm1):
    HIGH = jax.lax.Precision.HIGHEST
    dot = lambda a, b: jnp.dot(a, b, precision=HIGH)
    sig = jax.nn.sigmoid
    eps = 1e-5

    B, _ = seq.shape
    H = params["w_i"].shape[1]
    hid = params["w_q"].shape[1]
    d = hid // H
    K = params["conv_w"].shape[0]

    mu = seq.mean(-1, keepdims=True)
    var = ((seq - mu) ** 2).mean(-1, keepdims=True)
    x_n = (seq - mu) / jnp.sqrt(var + eps) * params["ln_w"] + params["ln_b"]

    x_t = dot(x_n, params["w_ul"]) + params["b_ul"]
    r_t = dot(x_n, params["w_ur"]) + params["b_ur"]

    pD = x_t.shape[1]
    xpad = jnp.pad(x_t, ((0, 0), (K - 1, 0)))
    x_cv = sum(params["conv_w"][t] * xpad[:, t:t + pD] for t in range(K)) \
        + params["conv_b"]
    x_c = x_cv * sig(x_cv)

    q = (dot(x_c, params["w_q"]) + params["b_q"]).reshape(B, H, d)
    k = ((dot(x_c, params["w_k"]) + params["b_k"]) / math.sqrt(d)).reshape(B, H, d)
    v = (dot(x_t, params["w_v"]) + params["b_v"]).reshape(B, H, d)
    i_t = dot(x_c, params["w_i"]) + params["b_i"]
    f_t = dot(x_c, params["w_f"]) + params["b_f"]
    o_t = dot(x_t, params["w_o"]) + params["b_o"]

    m_t = jnp.maximum(f_t + m_tm1, i_t)
    i_g = jnp.exp(i_t - m_t)
    f_g = jnp.exp(f_t - m_t + m_tm1)
    o_g = sig(o_t)

    c_t = (f_g[:, :, None, None] * c_tm1
           + i_g[:, :, None, None] * jnp.einsum('bhd,bhp->bhdp', v, k,
                                                precision=HIGH))
    n_t = f_g[:, :, None] * n_tm1 + i_g[:, :, None] * k

    num = jnp.einsum('bhdp,bhp->bhd', c_t, q, precision=HIGH)
    den = jnp.maximum(jnp.einsum('bhd,bhd->bh', n_t, q, precision=HIGH), 1.0)
    h_t = o_g * (num / den[:, :, None]).reshape(B, hid)

    hg = h_t.reshape(B, H, d)
    gmu = hg.mean(-1, keepdims=True)
    gvar = ((hg - gmu) ** 2).mean(-1, keepdims=True)
    h_norm = ((hg - gmu) / jnp.sqrt(gvar + eps)).reshape(B, hid) \
        * params["gn_w"] + params["gn_b"]

    skip = dot(x_c, params["w_skip"])
    out = (h_norm + skip) * (r_t * sig(r_t))
    out = dot(out, params["w_down"]) + params["b_down"]
    return out + seq, c_t, n_t, m_t


# --------------------------------------------------------------------------
# Self-test
# --------------------------------------------------------------------------
if __name__ == "__main__":
    # Shapes consistent with mLSTM(input_size=32, head_size=16, head_num=4)
    input_size, head_size, head_num = 32, 16, 4
    p_factor, ker_size = 2, 4
    batch = 8

    D = input_size
    H, d = head_num, head_size
    hid = H * d
    pD = p_factor * input_size

    keys = iter(jax.random.split(jax.random.PRNGKey(0), 40))

    def _linear(fan_in, fan_out):
        w = jax.random.normal(next(keys), (fan_in, fan_out), jnp.float32) \
            / math.sqrt(fan_in)
        b = 0.1 * jax.random.normal(next(keys), (fan_out,), jnp.float32)
        return w, b

    w_ul, b_ul = _linear(D, pD)
    w_ur, b_ur = _linear(D, hid)
    w_q, b_q = _linear(pD, hid)
    w_k, b_k = _linear(pD, hid)
    w_v, b_v = _linear(pD, hid)
    w_i, b_i = _linear(pD, H)
    w_f, b_f = _linear(pD, H)
    w_o, b_o = _linear(pD, hid)
    w_down, b_down = _linear(hid, D)

    params = dict(
        ln_w=1.0 + 0.1 * jax.random.normal(next(keys), (D,), jnp.float32),
        ln_b=0.1 * jax.random.normal(next(keys), (D,), jnp.float32),
        w_ul=w_ul, b_ul=b_ul, w_ur=w_ur, b_ur=b_ur,
        conv_w=0.5 * jax.random.normal(next(keys), (ker_size,), jnp.float32),
        conv_b=0.1 * jax.random.normal(next(keys), (), jnp.float32),
        w_q=w_q, b_q=b_q, w_k=w_k, b_k=b_k, w_v=w_v, b_v=b_v,
        w_i=w_i, b_i=b_i, w_f=w_f, b_f=b_f, w_o=w_o, b_o=b_o,
        w_skip=jax.random.normal(next(keys), (pD, hid), jnp.float32) / math.sqrt(pD),
        gn_w=1.0 + 0.1 * jax.random.normal(next(keys), (hid,), jnp.float32),
        gn_b=0.1 * jax.random.normal(next(keys), (hid,), jnp.float32),
        w_down=w_down, b_down=b_down,
    )

    seq = jax.random.normal(next(keys), (batch, D), jnp.float32)
    c0 = 0.1 * jax.random.normal(next(keys), (batch, H, d, d), jnp.float32)
    n0 = jnp.ones((batch, H, d), jnp.float32) \
        + 0.1 * jax.random.normal(next(keys), (batch, H, d), jnp.float32)
    m0 = 0.1 * jax.random.normal(next(keys), (batch, H), jnp.float32)

    ref_out, ref_c, ref_n, ref_m = mlstm_reference(params, seq, c0, n0, m0)

    def _check(name, got, ref, tol):
        assert got.shape == ref.shape, (name, got.shape, ref.shape)
        err = float(jnp.max(jnp.abs(got - ref)))
        assert jnp.allclose(got, ref, atol=tol, rtol=tol), \
            f"{name} mismatch: max abs err {err}"

    # 1) bit-parity mode (f32 MXU operands) -- tight check
    fwd_f32 = jax.jit(functools.partial(mlstm_forward, mxu_dtype=jnp.float32))
    out, (c_t, n_t, m_t) = jax.block_until_ready(fwd_f32(params, seq, c0, n0, m0))
    _check("out", out, ref_out, 1e-3)
    _check("c_t", c_t, ref_c, 1e-3)
    _check("n_t", n_t, ref_n, 1e-3)
    _check("m_t", m_t, ref_m, 1e-3)

    # 2) fast mode (bf16 MXU operands, default) -- loose check
    fwd_bf16 = jax.jit(mlstm_forward)
    out, (c_t, n_t, m_t) = jax.block_until_ready(fwd_bf16(params, seq, c0, n0, m0))
    _check("out(bf16)", out, ref_out, 1e-1)
    _check("c_t(bf16)", c_t, ref_c, 1e-1)
    _check("n_t(bf16)", n_t, ref_n, 1e-1)
    _check("m_t(bf16)", m_t, ref_m, 1e-1)

    print("KERNEL_OK")
</pallas_src>

<mosaic_0001>
module attributes {stable_mosaic.version = 11 : i64} {
  func.func @_mlstm_kernel(%arg0: i32, %arg1: memref<8x32xf32, #tpu.memory_space<vmem>>, %arg2: memref<8x1024xf32, #tpu.memory_space<vmem>>, %arg3: memref<8x64xf32, #tpu.memory_space<vmem>>, %arg4: memref<8x4xf32, #tpu.memory_space<vmem>>, %arg5: memref<1x32xf32, #tpu.memory_space<vmem>>, %arg6: memref<1x32xf32, #tpu.memory_space<vmem>>, %arg7: memref<32x128xf32, #tpu.memory_space<vmem>>, %arg8: memref<1x128xf32, #tpu.memory_space<vmem>>, %arg9: memref<64x64xf32, #tpu.memory_space<vmem>>, %arg10: memref<1x64xf32, #tpu.memory_space<vmem>>, %arg11: memref<64x256xf32, #tpu.memory_space<vmem>>, %arg12: memref<1x256xf32, #tpu.memory_space<vmem>>, %arg13: memref<64x128xf32, #tpu.memory_space<vmem>>, %arg14: memref<1x128xf32, #tpu.memory_space<vmem>>, %arg15: memref<1x64xf32, #tpu.memory_space<vmem>>, %arg16: memref<1x64xf32, #tpu.memory_space<vmem>>, %arg17: memref<64x32xf32, #tpu.memory_space<vmem>>, %arg18: memref<1x32xf32, #tpu.memory_space<vmem>>, %arg19: memref<4x64xf32, #tpu.memory_space<vmem>>, %arg20: memref<64x1024xf32, #tpu.memory_space<vmem>>, %arg21: memref<64x1024xf32, #tpu.memory_space<vmem>>, %arg22: memref<4x1024xf32, #tpu.memory_space<vmem>>, %arg23: memref<8x128xf32, #tpu.memory_space<vmem>>, %arg24: memref<8x1024xf32, #tpu.memory_space<vmem>>) attributes {dimension_semantics = [#tpu.dimension_semantics<parallel>], iteration_bounds = array<i64: 1>, scalar_prefetch = 0 : i64, scratch_operands = 0 : i64, tpu.core_type = #tpu.core_type<tc>, window_params = [{transform_indices = @transform_0, window_bounds = array<i64: 8, 32>}, {transform_indices = @transform_1, window_bounds = array<i64: 8, 1024>}, {transform_indices = @transform_2, window_bounds = array<i64: 8, 64>}, {transform_indices = @transform_3, window_bounds = array<i64: 8, 4>}, {pipeline_mode = #tpu.pipeline_mode<synchronous>, transform_indices = @transform_4, window_bounds = array<i64: 1, 32>}, {pipeline_mode = #tpu.pipeline_mode<synchronous>, transform_indices = @transform_5, window_bounds = array<i64: 1, 32>}, {pipeline_mode = #tpu.pipeline_mode<synchronous>, transform_indices = @transform_6, window_bounds = array<i64: 32, 128>}, {pipeline_mode = #tpu.pipeline_mode<synchronous>, transform_indices = @transform_7, window_bounds = array<i64: 1, 128>}, {pipeline_mode = #tpu.pipeline_mode<synchronous>, transform_indices = @transform_8, window_bounds = array<i64: 64, 64>}, {pipeline_mode = #tpu.pipeline_mode<synchronous>, transform_indices = @transform_9, window_bounds = array<i64: 1, 64>}, {pipeline_mode = #tpu.pipeline_mode<synchronous>, transform_indices = @transform_10, window_bounds = array<i64: 64, 256>}, {pipeline_mode = #tpu.pipeline_mode<synchronous>, transform_indices = @transform_11, window_bounds = array<i64: 1, 256>}, {pipeline_mode = #tpu.pipeline_mode<synchronous>, transform_indices = @transform_12, window_bounds = array<i64: 64, 128>}, {pipeline_mode = #tpu.pipeline_mode<synchronous>, transform_indices = @transform_13, window_bounds = array<i64: 1, 128>}, {pipeline_mode = #tpu.pipeline_mode<synchronous>, transform_indices = @transform_14, window_bounds = array<i64: 1, 64>}, {pipeline_mode = #tpu.pipeline_mode<synchronous>, transform_indices = @transform_15, window_bounds = array<i64: 1, 64>}, {pipeline_mode = #tpu.pipeline_mode<synchronous>, transform_indices = @transform_16, window_bounds = array<i64: 64, 32>}, {pipeline_mode = #tpu.pipeline_mode<synchronous>, transform_indices = @transform_17, window_bounds = array<i64: 1, 32>}, {pipeline_mode = #tpu.pipeline_mode<synchronous>, transform_indices = @transform_18, window_bounds = array<i64: 4, 64>}, {pipeline_mode = #tpu.pipeline_mode<synchronous>, transform_indices = @transform_19, window_bounds = array<i64: 64, 1024>}, {pipeline_mode = #tpu.pipeline_mode<synchronous>, transform_indices = @transform_20, window_bounds = array<i64: 64, 1024>}, {pipeline_mode = #tpu.pipeline_mode<synchronous>, transform_indices = @transform_21, window_bounds = array<i64: 4, 1024>}, {transform_indices = @transform_22, window_bounds = array<i64: 8, 128>}, {transform_indices = @transform_23, window_bounds = array<i64: 8, 1024>}]} {
    %c0 = arith.constant 0 : index
    %c0_0 = arith.constant 0 : index
    %0 = vector.load %arg19[%c0, %c0_0] : memref<4x64xf32, #tpu.memory_space<vmem>>, vector<4x64xf32>
    %c0_1 = arith.constant 0 : index
    %c0_2 = arith.constant 0 : index
    %1 = vector.load %arg20[%c0_1, %c0_2] : memref<64x1024xf32, #tpu.memory_space<vmem>>, vector<64x1024xf32>
    %c0_3 = arith.constant 0 : index
    %c0_4 = arith.constant 0 : index
    %2 = vector.load %arg21[%c0_3, %c0_4] : memref<64x1024xf32, #tpu.memory_space<vmem>>, vector<64x1024xf32>
    %c0_5 = arith.constant 0 : index
    %c0_6 = arith.constant 0 : index
    %3 = vector.load %arg22[%c0_5, %c0_6] : memref<4x1024xf32, #tpu.memory_space<vmem>>, vector<4x1024xf32>
    %c0_7 = arith.constant 0 : index
    %c0_8 = arith.constant 0 : index
    %4 = vector.load %arg1[%c0_7, %c0_8] : memref<8x32xf32, #tpu.memory_space<vmem>>, vector<8x32xf32>
    %cst = arith.constant dense<0.000000e+00> : vector<8xf32>
    %5 = vector.multi_reduction <add>, %4, %cst [1] : vector<8x32xf32> to vector<8xf32>
    %6 = vector.shape_cast %5 : vector<8xf32> to vector<8x1xf32>
    %cst_9 = arith.constant 3.200000e+01 : f32
    %7 = vector.broadcast %cst_9 : f32 to vector<8x1xf32>
    %8 = arith.divf %6, %7 : vector<8x1xf32>
    %9 = vector.broadcast %8 : vector<8x1xf32> to vector<8x32xf32>
    %10 = arith.subf %4, %9 : vector<8x32xf32>
    %11 = arith.mulf %10, %10 : vector<8x32xf32>
    %cst_10 = arith.constant dense<0.000000e+00> : vector<8xf32>
    %12 = vector.multi_reduction <add>, %11, %cst_10 [1] : vector<8x32xf32> to vector<8xf32>
    %13 = vector.shape_cast %12 : vector<8xf32> to vector<8x1xf32>
    %cst_11 = arith.constant 3.200000e+01 : f32
    %14 = vector.broadcast %cst_11 : f32 to vector<8x1xf32>
    %15 = arith.divf %13, %14 : vector<8x1xf32>
    %cst_12 = arith.constant 9.99999974E-6 : f32
    %16 = vector.broadcast %cst_12 : f32 to vector<8x1xf32>
    %17 = arith.addf %15, %16 : vector<8x1xf32>
    %18 = math.rsqrt %17 : vector<8x1xf32>
    %19 = vector.broadcast %18 : vector<8x1xf32> to vector<8x32xf32>
    %20 = arith.mulf %10, %19 : vector<8x32xf32>
    %c0_13 = arith.constant 0 : index
    %c0_14 = arith.constant 0 : index
    %21 = vector.load %arg5[%c0_13, %c0_14] : memref<1x32xf32, #tpu.memory_space<vmem>>, vector<1x32xf32>
    %22 = vector.broadcast %21 : vector<1x32xf32> to vector<8x32xf32>
    %23 = arith.mulf %20, %22 : vector<8x32xf32>
    %c0_15 = arith.constant 0 : index
    %c0_16 = arith.constant 0 : index
    %24 = vector.load %arg6[%c0_15, %c0_16] : memref<1x32xf32, #tpu.memory_space<vmem>>, vector<1x32xf32>
    %25 = vector.broadcast %24 : vector<1x32xf32> to vector<8x32xf32>
    %26 = arith.addf %23, %25 : vector<8x32xf32>
    %c0_17 = arith.constant 0 : index
    %c0_18 = arith.constant 0 : index
    %27 = vector.load %arg7[%c0_17, %c0_18] : memref<32x128xf32, #tpu.memory_space<vmem>>, vector<32x128xf32>
    %cst_19 = arith.constant dense<0.000000e+00> : vector<8x128xf32>
    %28 = tpu.matmul %26, %27, %cst_19 {dimension_numbers = #tpu.dot_dimension_numbers<[1], [0], [0], [1], [0, 0, 1, 1], [], []>} : vector<8x32xf32>, vector<32x128xf32>, vector<8x128xf32> -> vector<8x128xf32>
    %c0_20 = arith.constant 0 : index
    %c0_21 = arith.constant 0 : index
    %29 = vector.load %arg8[%c0_20, %c0_21] : memref<1x128xf32, #tpu.memory_space<vmem>>, vector<1x128xf32>
    %30 = vector.broadcast %29 : vector<1x128xf32> to vector<8x128xf32>
    %31 = arith.addf %28, %30 : vector<8x128xf32>
    %32 = vector.extract_strided_slice %31 {offsets = [0, 0], sizes = [8, 64], strides = [1, 1]} : vector<8x128xf32> to vector<8x64xf32>
    %33 = vector.extract_strided_slice %31 {offsets = [0, 64], sizes = [8, 64], strides = [1, 1]} : vector<8x128xf32> to vector<8x64xf32>
    %c0_22 = arith.constant 0 : index
    %c0_23 = arith.constant 0 : index
    %34 = vector.load %arg9[%c0_22, %c0_23] : memref<64x64xf32, #tpu.memory_space<vmem>>, vector<64x64xf32>
    %cst_24 = arith.constant dense<0.000000e+00> : vector<8x64xf32>
    %35 = tpu.matmul %32, %34, %cst_24 {dimension_numbers = #tpu.dot_dimension_numbers<[1], [0], [0], [1], [0, 0, 1, 1], [], []>} : vector<8x64xf32>, vector<64x64xf32>, vector<8x64xf32> -> vector<8x64xf32>
    %c0_25 = arith.constant 0 : index
    %c0_26 = arith.constant 0 : index
    %36 = vector.load %arg10[%c0_25, %c0_26] : memref<1x64xf32, #tpu.memory_space<vmem>>, vector<1x64xf32>
    %37 = vector.broadcast %36 : vector<1x64xf32> to vector<8x64xf32>
    %38 = arith.addf %35, %37 : vector<8x64xf32>
    %cst_27 = arith.constant 0.000000e+00 : f32
    %39 = vector.broadcast %cst_27 : f32 to vector<8x64xf32>
    %40 = arith.subf %39, %38 : vector<8x64xf32>
    %41 = math.exp %40 : vector<8x64xf32>
    %cst_28 = arith.constant 1.000000e+00 : f32
    %42 = vector.broadcast %cst_28 : f32 to vector<8x64xf32>
    %43 = arith.addf %42, %41 : vector<8x64xf32>
    %44 = tpu.reciprocal %43 : vector<8x64xf32> -> vector<8x64xf32>
    %45 = arith.mulf %38, %44 : vector<8x64xf32>
    %c0_29 = arith.constant 0 : index
    %c0_30 = arith.constant 0 : index
    %46 = vector.load %arg11[%c0_29, %c0_30] : memref<64x256xf32, #tpu.memory_space<vmem>>, vector<64x256xf32>
    %cst_31 = arith.constant dense<0.000000e+00> : vector<8x256xf32>
    %47 = tpu.matmul %45, %46, %cst_31 {dimension_numbers = #tpu.dot_dimension_numbers<[1], [0], [0], [1], [0, 0, 1, 1], [], []>} : vector<8x64xf32>, vector<64x256xf32>, vector<8x256xf32> -> vector<8x256xf32>
    %c0_32 = arith.constant 0 : index
    %c0_33 = arith.constant 0 : index
    %48 = vector.load %arg12[%c0_32, %c0_33] : memref<1x256xf32, #tpu.memory_space<vmem>>, vector<1x256xf32>
    %49 = vector.broadcast %48 : vector<1x256xf32> to vector<8x256xf32>
    %50 = arith.addf %47, %49 : vector<8x256xf32>
    %51 = vector.extract_strided_slice %50 {offsets = [0, 0], sizes = [8, 64], strides = [1, 1]} : vector<8x256xf32> to vector<8x64xf32>
    %52 = vector.extract_strided_slice %50 {offsets = [0, 64], sizes = [8, 64], strides = [1, 1]} : vector<8x256xf32> to vector<8x64xf32>
    %cst_34 = arith.constant 2.500000e-01 : f32
    %53 = vector.broadcast %cst_34 : f32 to vector<8x64xf32>
    %54 = arith.mulf %52, %53 : vector<8x64xf32>
    %55 = vector.extract_strided_slice %50 {offsets = [0, 128], sizes = [8, 64], strides = [1, 1]} : vector<8x256xf32> to vector<8x64xf32>
    %56 = vector.extract_strided_slice %50 {offsets = [0, 192], sizes = [8, 4], strides = [1, 1]} : vector<8x256xf32> to vector<8x4xf32>
    %57 = vector.extract_strided_slice %50 {offsets = [0, 196], sizes = [8, 4], strides = [1, 1]} : vector<8x256xf32> to vector<8x4xf32>
    %c0_35 = arith.constant 0 : index
    %c0_36 = arith.constant 0 : index
    %58 = vector.load %arg13[%c0_35, %c0_36] : memref<64x128xf32, #tpu.memory_space<vmem>>, vector<64x128xf32>
    %cst_37 = arith.constant dense<0.000000e+00> : vector<8x128xf32>
    %59 = tpu.matmul %32, %58, %cst_37 {dimension_numbers = #tpu.dot_dimension_numbers<[1], [0], [0], [1], [0, 0, 1, 1], [], []>} : vector<8x64xf32>, vector<64x128xf32>, vector<8x128xf32> -> vector<8x128xf32>
    %c0_38 = arith.constant 0 : index
    %c0_39 = arith.constant 0 : index
    %60 = vector.load %arg14[%c0_38, %c0_39] : memref<1x128xf32, #tpu.memory_space<vmem>>, vector<1x128xf32>
    %61 = vector.broadcast %60 : vector<1x128xf32> to vector<8x128xf32>
    %62 = arith.addf %59, %61 : vector<8x128xf32>
    %63 = vector.extract_strided_slice %62 {offsets = [0, 0], sizes = [8, 64], strides = [1, 1]} : vector<8x128xf32> to vector<8x64xf32>
    %64 = vector.extract_strided_slice %62 {offsets = [0, 64], sizes = [8, 64], strides = [1, 1]} : vector<8x128xf32> to vector<8x64xf32>
    %c0_40 = arith.constant 0 : index
    %c0_41 = arith.constant 0 : index
    %65 = vector.load %arg4[%c0_40, %c0_41] : memref<8x4xf32, #tpu.memory_space<vmem>>, vector<8x4xf32>
    %66 = arith.addf %57, %65 : vector<8x4xf32>
    %67 = arith.maximumf %66, %56 : vector<8x4xf32>
    %68 = arith.subf %56, %67 : vector<8x4xf32>
    %69 = math.exp %68 : vector<8x4xf32>
    %70 = arith.subf %57, %67 : vector<8x4xf32>
    %71 = arith.addf %70, %65 : vector<8x4xf32>
    %72 = math.exp %71 : vector<8x4xf32>
    %cst_42 = arith.constant 0.000000e+00 : f32
    %73 = vector.broadcast %cst_42 : f32 to vector<8x64xf32>
    %74 = arith.subf %73, %64 : vector<8x64xf32>
    %75 = math.exp %74 : vector<8x64xf32>
    %cst_43 = arith.constant 1.000000e+00 : f32
    %76 = vector.broadcast %cst_43 : f32 to vector<8x64xf32>
    %77 = arith.addf %76, %75 : vector<8x64xf32>
    %78 = tpu.reciprocal %77 : vector<8x64xf32> -> vector<8x64xf32>
    %cst_44 = arith.constant dense<0.000000e+00> : vector<8x64xf32>
    %79 = tpu.matmul %69, %0, %cst_44 {dimension_numbers = #tpu.dot_dimension_numbers<[1], [0], [0], [1], [0, 0, 1, 1], [], []>} : vector<8x4xf32>, vector<4x64xf32>, vector<8x64xf32> -> vector<8x64xf32>
    %cst_45 = arith.constant dense<0.000000e+00> : vector<8x64xf32>
    %80 = tpu.matmul %72, %0, %cst_45 {dimension_numbers = #tpu.dot_dimension_numbers<[1], [0], [0], [1], [0, 0, 1, 1], [], []>} : vector<8x4xf32>, vector<4x64xf32>, vector<8x64xf32> -> vector<8x64xf32>
    %cst_46 = arith.constant dense<0.000000e+00> : vector<8x1024xf32>
    %81 = tpu.matmul %72, %3, %cst_46 {dimension_numbers = #tpu.dot_dimension_numbers<[1], [0], [0], [1], [0, 0, 1, 1], [], []>} : vector<8x4xf32>, vector<4x1024xf32>, vector<8x1024xf32> -> vector<8x1024xf32>
    %cst_47 = arith.constant dense<0.000000e+00> : vector<8x1024xf32>
    %82 = tpu.matmul %54, %2, %cst_47 {dimension_numbers = #tpu.dot_dimension_numbers<[1], [0], [0], [1], [0, 0, 1, 1], [], []>} : vector<8x64xf32>, vector<64x1024xf32>, vector<8x1024xf32> -> vector<8x1024xf32>
    %cst_48 = arith.constant dense<0.000000e+00> : vector<8x1024xf32>
    %83 = tpu.matmul %51, %2, %cst_48 {dimension_numbers = #tpu.dot_dimension_numbers<[1], [0], [0], [1], [0, 0, 1, 1], [], []>} : vector<8x64xf32>, vector<64x1024xf32>, vector<8x1024xf32> -> vector<8x1024xf32>
    %c0_49 = arith.constant 0 : index
    %c0_50 = arith.constant 0 : index
    %84 = vector.load %arg2[%c0_49, %c0_50] : memref<8x1024xf32, #tpu.memory_space<vmem>>, vector<8x1024xf32>
    %c0_51 = arith.constant 0 : index
    %c0_52 = arith.constant 0 : index
    %85 = vector.load %arg3[%c0_51, %c0_52] : memref<8x64xf32, #tpu.memory_space<vmem>>, vector<8x64xf32>
    %86 = arith.mulf %81, %84 : vector<8x1024xf32>
    %87 = arith.mulf %79, %63 : vector<8x64xf32>
    %cst_53 = arith.constant dense<0.000000e+00> : vector<8x1024xf32>
    %88 = tpu.matmul %87, %1, %cst_53 {dimension_numbers = #tpu.dot_dimension_numbers<[1], [0], [0], [1], [0, 0, 1, 1], [], []>} : vector<8x64xf32>, vector<64x1024xf32>, vector<8x1024xf32> -> vector<8x1024xf32>
    %89 = arith.mulf %88, %82 : vector<8x1024xf32>
    %90 = arith.addf %86, %89 : vector<8x1024xf32>
    %91 = arith.mulf %80, %85 : vector<8x64xf32>
    %92 = arith.mulf %79, %54 : vector<8x64xf32>
    %93 = arith.addf %91, %92 : vector<8x64xf32>
    %94 = arith.mulf %90, %83 : vector<8x1024xf32>
    %cst_54 = arith.constant dense<0.000000e+00> : vector<8x64xf32>
    %95 = tpu.matmul %94, %1, %cst_54 {dimension_numbers = #tpu.dot_dimension_numbers<[1], [1], [0], [0], [0, 0, 1, 0], [], []>} : vector<8x1024xf32>, vector<64x1024xf32>, vector<8x64xf32> -> vector<8x64xf32>
    %96 = arith.mulf %93, %51 : vector<8x64xf32>
    %cst_55 = arith.constant dense<0.000000e+00> : vector<8x4xf32>
    %97 = tpu.matmul %96, %0, %cst_55 {dimension_numbers = #tpu.dot_dimension_numbers<[1], [1], [0], [0], [0, 0, 1, 0], [], []>} : vector<8x64xf32>, vector<4x64xf32>, vector<8x4xf32> -> vector<8x4xf32>
    %cst_56 = arith.constant 1.000000e+00 : f32
    %98 = vector.broadcast %cst_56 : f32 to vector<8x4xf32>
    %99 = arith.maximumf %97, %98 : vector<8x4xf32>
    %100 = tpu.reciprocal %99 : vector<8x4xf32> -> vector<8x4xf32>
    %101 = arith.mulf %78, %95 : vector<8x64xf32>
    %cst_57 = arith.constant dense<0.000000e+00> : vector<8x64xf32>
    %102 = tpu.matmul %100, %0, %cst_57 {dimension_numbers = #tpu.dot_dimension_numbers<[1], [0], [0], [1], [0, 0, 1, 1], [], []>} : vector<8x4xf32>, vector<4x64xf32>, vector<8x64xf32> -> vector<8x64xf32>
    %103 = arith.mulf %101, %102 : vector<8x64xf32>
    %cst_58 = arith.constant dense<0.000000e+00> : vector<8x4xf32>
    %104 = tpu.matmul %103, %0, %cst_58 {dimension_numbers = #tpu.dot_dimension_numbers<[1], [1], [0], [0], [0, 0, 1, 0], [], []>} : vector<8x64xf32>, vector<4x64xf32>, vector<8x4xf32> -> vector<8x4xf32>
    %cst_59 = arith.constant 6.250000e-02 : f32
    %105 = vector.broadcast %cst_59 : f32 to vector<8x4xf32>
    %106 = arith.mulf %104, %105 : vector<8x4xf32>
    %cst_60 = arith.constant dense<0.000000e+00> : vector<8x64xf32>
    %107 = tpu.matmul %106, %0, %cst_60 {dimension_numbers = #tpu.dot_dimension_numbers<[1], [0], [0], [1], [0, 0, 1, 1], [], []>} : vector<8x4xf32>, vector<4x64xf32>, vector<8x64xf32> -> vector<8x64xf32>
    %108 = arith.subf %103, %107 : vector<8x64xf32>
    %109 = arith.mulf %108, %108 : vector<8x64xf32>
    %cst_61 = arith.constant dense<0.000000e+00> : vector<8x4xf32>
    %110 = tpu.matmul %109, %0, %cst_61 {dimension_numbers = #tpu.dot_dimension_numbers<[1], [1], [0], [0], [0, 0, 1, 0], [], []>} : vector<8x64xf32>, vector<4x64xf32>, vector<8x4xf32> -> vector<8x4xf32>
    %cst_62 = arith.constant 6.250000e-02 : f32
    %111 = vector.broadcast %cst_62 : f32 to vector<8x4xf32>
    %112 = arith.mulf %110, %111 : vector<8x4xf32>
    %cst_63 = arith.constant 9.99999974E-6 : f32
    %113 = vector.broadcast %cst_63 : f32 to vector<8x4xf32>
    %114 = arith.addf %112, %113 : vector<8x4xf32>
    %115 = math.rsqrt %114 : vector<8x4xf32>
    %cst_64 = arith.constant dense<0.000000e+00> : vector<8x64xf32>
    %116 = tpu.matmul %115, %0, %cst_64 {dimension_numbers = #tpu.dot_dimension_numbers<[1], [0], [0], [1], [0, 0, 1, 1], [], []>} : vector<8x4xf32>, vector<4x64xf32>, vector<8x64xf32> -> vector<8x64xf32>
    %117 = arith.mulf %108, %116 : vector<8x64xf32>
    %c0_65 = arith.constant 0 : index
    %c0_66 = arith.constant 0 : index
    %118 = vector.load %arg15[%c0_65, %c0_66] : memref<1x64xf32, #tpu.memory_space<vmem>>, vector<1x64xf32>
    %119 = vector.broadcast %118 : vector<1x64xf32> to vector<8x64xf32>
    %120 = arith.mulf %117, %119 : vector<8x64xf32>
    %c0_67 = arith.constant 0 : index
    %c0_68 = arith.constant 0 : index
    %121 = vector.load %arg16[%c0_67, %c0_68] : memref<1x64xf32, #tpu.memory_space<vmem>>, vector<1x64xf32>
    %122 = vector.broadcast %121 : vector<1x64xf32> to vector<8x64xf32>
    %123 = arith.addf %120, %122 : vector<8x64xf32>
    %124 = arith.addf %123, %55 : vector<8x64xf32>
    %cst_69 = arith.constant 0.000000e+00 : f32
    %125 = vector.broadcast %cst_69 : f32 to vector<8x64xf32>
    %126 = arith.subf %125, %33 : vector<8x64xf32>
    %127 = math.exp %126 : vector<8x64xf32>
    %cst_70 = arith.constant 1.000000e+00 : f32
    %128 = vector.broadcast %cst_70 : f32 to vector<8x64xf32>
    %129 = arith.addf %128, %127 : vector<8x64xf32>
    %130 = tpu.reciprocal %129 : vector<8x64xf32> -> vector<8x64xf32>
    %131 = arith.mulf %33, %130 : vector<8x64xf32>
    %132 = arith.mulf %124, %131 : vector<8x64xf32>
    %c0_71 = arith.constant 0 : index
    %c0_72 = arith.constant 0 : index
    %133 = vector.load %arg17[%c0_71, %c0_72] : memref<64x32xf32, #tpu.memory_space<vmem>>, vector<64x32xf32>
    %cst_73 = arith.constant dense<0.000000e+00> : vector<8x32xf32>
    %134 = tpu.matmul %132, %133, %cst_73 {dimension_numbers = #tpu.dot_dimension_numbers<[1], [0], [0], [1], [0, 0, 1, 1], [], []>} : vector<8x64xf32>, vector<64x32xf32>, vector<8x32xf32> -> vector<8x32xf32>
    %c0_74 = arith.constant 0 : index
    %c0_75 = arith.constant 0 : index
    %135 = vector.load %arg18[%c0_74, %c0_75] : memref<1x32xf32, #tpu.memory_space<vmem>>, vector<1x32xf32>
    %136 = vector.broadcast %135 : vector<1x32xf32> to vector<8x32xf32>
    %137 = arith.addf %134, %136 : vector<8x32xf32>
    %138 = arith.addf %137, %4 : vector<8x32xf32>
    %c0_76 = arith.constant 0 : index
    %c0_77 = arith.constant 0 : index
    %139 = vector.load %arg23[%c0_76, %c0_77] : memref<8x128xf32, #tpu.memory_space<vmem>>, vector<8x32xf32>
    tpu.vector_store %arg23[%c0_76, %c0_77], %138 {strides = array<i32>} : memref<8x128xf32, #tpu.memory_space<vmem>>, vector<8x32xf32>,
    %c0_78 = arith.constant 0 : index
    %c32 = arith.constant 32 : index
    %140 = vector.load %arg23[%c0_78, %c32] : memref<8x128xf32, #tpu.memory_space<vmem>>, vector<8x64xf32>
    tpu.vector_store %arg23[%c0_78, %c32], %93 {strides = array<i32>} : memref<8x128xf32, #tpu.memory_space<vmem>>, vector<8x64xf32>,
    %c0_79 = arith.constant 0 : index
    %c96 = arith.constant 96 : index
    %141 = vector.load %arg23[%c0_79, %c96] : memref<8x128xf32, #tpu.memory_space<vmem>>, vector<8x4xf32>
    tpu.vector_store %arg23[%c0_79, %c96], %67 {strides = array<i32>} : memref<8x128xf32, #tpu.memory_space<vmem>>, vector<8x4xf32>,
    %c0_80 = arith.constant 0 : index
    %c0_81 = arith.constant 0 : index
    %142 = vector.load %arg24[%c0_80, %c0_81] : memref<8x1024xf32, #tpu.memory_space<vmem>>, vector<8x1024xf32>
    tpu.vector_store %arg24[%c0_80, %c0_81], %90 {strides = array<i32>} : memref<8x1024xf32, #tpu.memory_space<vmem>>, vector<8x1024xf32>,
    return
  }
  func.func @transform_0(%arg0: i32) -> (i32, i32) {
    %c0_i32 = arith.constant 0 : i32
    %c0_i32_0 = arith.constant 0 : i32
    return %arg0, %c0_i32 : i32, i32
  }
  func.func @transform_1(%arg0: i32) -> (i32, i32) {
    %c0_i32 = arith.constant 0 : i32
    %c0_i32_0 = arith.constant 0 : i32
    return %arg0, %c0_i32 : i32, i32
  }
  func.func @transform_2(%arg0: i32) -> (i32, i32) {
    %c0_i32 = arith.constant 0 : i32
    %c0_i32_0 = arith.constant 0 : i32
    return %arg0, %c0_i32 : i32, i32
  }
  func.func @transform_3(%arg0: i32) -> (i32, i32) {
    %c0_i32 = arith.constant 0 : i32
    %c0_i32_0 = arith.constant 0 : i32
    return %arg0, %c0_i32 : i32, i32
  }
  func.func @transform_4(%arg0: i32) -> (i32, i32) {
    %c0_i32 = arith.constant 0 : i32
    %c0_i32_0 = arith.constant 0 : i32
    %c0_i32_1 = arith.constant 0 : i32
    return %c0_i32, %c0_i32_0 : i32, i32
  }
  func.func @transform_5(%arg0: i32) -> (i32, i32) {
    %c0_i32 = arith.constant 0 : i32
    %c0_i32_0 = arith.constant 0 : i32
    %c0_i32_1 = arith.constant 0 : i32
    return %c0_i32, %c0_i32_0 : i32, i32
  }
  func.func @transform_6(%arg0: i32) -> (i32, i32) {
    %c0_i32 = arith.constant 0 : i32
    %c0_i32_0 = arith.constant 0 : i32
    %c0_i32_1 = arith.constant 0 : i32
    return %c0_i32, %c0_i32_0 : i32, i32
  }
  func.func @transform_7(%arg0: i32) -> (i32, i32) {
    %c0_i32 = arith.constant 0 : i32
    %c0_i32_0 = arith.constant 0 : i32
    %c0_i32_1 = arith.constant 0 : i32
    return %c0_i32, %c0_i32_0 : i32, i32
  }
  func.func @transform_8(%arg0: i32) -> (i32, i32) {
    %c0_i32 = arith.constant 0 : i32
    %c0_i32_0 = arith.constant 0 : i32
    %c0_i32_1 = arith.constant 0 : i32
    return %c0_i32, %c0_i32_0 : i32, i32
  }
  func.func @transform_9(%arg0: i32) -> (i32, i32) {
    %c0_i32 = arith.constant 0 : i32
    %c0_i32_0 = arith.constant 0 : i32
    %c0_i32_1 = arith.constant 0 : i32
    return %c0_i32, %c0_i32_0 : i32, i32
  }
  func.func @transform_10(%arg0: i32) -> (i32, i32) {
    %c0_i32 = arith.constant 0 : i32
    %c0_i32_0 = arith.constant 0 : i32
    %c0_i32_1 = arith.constant 0 : i32
    return %c0_i32, %c0_i32_0 : i32, i32
  }
  func.func @transform_11(%arg0: i32) -> (i32, i32) {
    %c0_i32 = arith.constant 0 : i32
    %c0_i32_0 = arith.constant 0 : i32
    %c0_i32_1 = arith.constant 0 : i32
    return %c0_i32, %c0_i32_0 : i32, i32
  }
  func.func @transform_12(%arg0: i32) -> (i32, i32) {
    %c0_i32 = arith.constant 0 : i32
    %c0_i32_0 = arith.constant 0 : i32
    %c0_i32_1 = arith.constant 0 : i32
    return %c0_i32, %c0_i32_0 : i32, i32
  }
  func.func @transform_13(%arg0: i32) -> (i32, i32) {
    %c0_i32 = arith.constant 0 : i32
    %c0_i32_0 = arith.constant 0 : i32
    %c0_i32_1 = arith.constant 0 : i32
    return %c0_i32, %c0_i32_0 : i32, i32
  }
  func.func @transform_14(%arg0: i32) -> (i32, i32) {
    %c0_i32 = arith.constant 0 : i32
    %c0_i32_0 = arith.constant 0 : i32
    %c0_i32_1 = arith.constant 0 : i32
    return %c0_i32, %c0_i32_0 : i32, i32
  }
  func.func @transform_15(%arg0: i32) -> (i32, i32) {
    %c0_i32 = arith.constant 0 : i32
    %c0_i32_0 = arith.constant 0 : i32
    %c0_i32_1 = arith.constant 0 : i32
    return %c0_i32, %c0_i32_0 : i32, i32
  }
  func.func @transform_16(%arg0: i32) -> (i32, i32) {
    %c0_i32 = arith.constant 0 : i32
    %c0_i32_0 = arith.constant 0 : i32
    %c0_i32_1 = arith.constant 0 : i32
    return %c0_i32, %c0_i32_0 : i32, i32
  }
  func.func @transform_17(%arg0: i32) -> (i32, i32) {
    %c0_i32 = arith.constant 0 : i32
    %c0_i32_0 = arith.constant 0 : i32
    %c0_i32_1 = arith.constant 0 : i32
    return %c0_i32, %c0_i32_0 : i32, i32
  }
  func.func @transform_18(%arg0: i32) -> (i32, i32) {
    %c0_i32 = arith.constant 0 : i32
    %c0_i32_0 = arith.constant 0 : i32
    %c0_i32_1 = arith.constant 0 : i32
    return %c0_i32, %c0_i32_0 : i32, i32
  }
  func.func @transform_19(%arg0: i32) -> (i32, i32) {
    %c0_i32 = arith.constant 0 : i32
    %c0_i32_0 = arith.constant 0 : i32
    %c0_i32_1 = arith.constant 0 : i32
    return %c0_i32, %c0_i32_0 : i32, i32
  }
  func.func @transform_20(%arg0: i32) -> (i32, i32) {
    %c0_i32 = arith.constant 0 : i32
    %c0_i32_0 = arith.constant 0 : i32
    %c0_i32_1 = arith.constant 0 : i32
    return %c0_i32, %c0_i32_0 : i32, i32
  }
  func.func @transform_21(%arg0: i32) -> (i32, i32) {
    %c0_i32 = arith.constant 0 : i32
    %c0_i32_0 = arith.constant 0 : i32
    %c0_i32_1 = arith.constant 0 : i32
    return %c0_i32, %c0_i32_0 : i32, i32
  }
  func.func @transform_22(%arg0: i32) -> (i32, i32) {
    %c0_i32 = arith.constant 0 : i32
    %c0_i32_0 = arith.constant 0 : i32
    return %arg0, %c0_i32 : i32, i32
  }
  func.func @transform_23(%arg0: i32) -> (i32, i32) {
    %c0_i32 = arith.constant 0 : i32
    %c0_i32_0 = arith.constant 0 : i32
    return %arg0, %c0_i32 : i32, i32
  }
}

</mosaic_0001>

<bundles_post_ra>
// kernel: mlstm_forward.1
= control target key start
LH: loop header
LB: loop body
LE: loop exit
PB: predicated region body
PF: predicated region fallthrough
CT: control target
= control target key end

     0   :  { %vm207_vm0 = vcmask 261120   ;;  %v1819_v2 = vmov 32.0   ;;  %vm290_vm5 = vcmask 523264   ;;  %s1820_s29 = smov 68   ;;  %s1824_s30 = smov 60   ;;  %vm477_vm10 = vcmask 1043456   ;;  %s3192_s0 = inlined_call_operand.vmem [shape: f32[8,32], index: 0, kind: input, shape index: {}]   ;;  %s3193_s4 = inlined_call_operand.vmem [shape: f32[1,32], index: 4, kind: input, shape index: {}]   ;;  %s3194_s5 = inlined_call_operand.vmem [shape: f32[1,32], index: 5, kind: input, shape index: {}]   ;;  %s3195_s7 = inlined_call_operand.vmem [shape: f32[1,128], index: 7, kind: input, shape index: {}]   ;;  %s3196_s6 = inlined_call_operand.vmem [shape: f32[32,128], index: 6, kind: input, shape index: {}]   ;;  %s3197_s8 = inlined_call_operand.vmem [shape: f32[64,64], index: 8, kind: input, shape index: {}]   ;;  %s3198_s12 = inlined_call_operand.vmem [shape: f32[64,128], index: 12, kind: input, shape index: {}]   ;;  %s3199_s9 = inlined_call_operand.vmem [shape: f32[1,64], index: 9, kind: input, shape index: {}]   ;;  %s3200_s13 = inlined_call_operand.vmem [shape: f32[1,128], index: 13, kind: input, shape index: {}]   ;;  %s3201_s10 = inlined_call_operand.vmem [shape: f32[64,256], index: 10, kind: input, shape index: {}]   ;;  %s3202_s3 = inlined_call_operand.vmem [shape: f32[8,4], index: 3, kind: input, shape index: {}]   ;;  %s3203_s11 = inlined_call_operand.vmem [shape: f32[1,256], index: 11, kind: input, shape index: {}]   ;;  %s3204_s21 = inlined_call_operand.vmem [shape: f32[4,1024], index: 21, kind: input, shape index: {}]   ;;  %s3205_s20 = inlined_call_operand.vmem [shape: f32[64,1024], index: 20, kind: input, shape index: {}]   ;;  %s3206_s18 = inlined_call_operand.vmem [shape: f32[4,64], index: 18, kind: input, shape index: {}]   ;;  %s3207_s19 = inlined_call_operand.vmem [shape: f32[64,1024], index: 19, kind: input, shape index: {}]   ;;  %s3208_s2 = inlined_call_operand.vmem [shape: f32[8,64], index: 2, kind: input, shape index: {}]   ;;  %s3209_s1 = inlined_call_operand.vmem [shape: f32[8,1024], index: 1, kind: input, shape index: {}, may-alias: {1,23}]   ;;  %s3210_s23 = inlined_call_operand.vmem [shape: f32[8,1024], index: 23, kind: output, shape index: {1}, may-alias: {1,23}]   ;;  %s3211_s15 = inlined_call_operand.vmem [shape: f32[1,64], index: 15, kind: input, shape index: {}]   ;;  %s3212_s14 = inlined_call_operand.vmem [shape: f32[1,64], index: 14, kind: input, shape index: {}]   ;;  %s3213_s16 = inlined_call_operand.vmem [shape: f32[64,32], index: 16, kind: input, shape index: {}]   ;;  %s3214_s17 = inlined_call_operand.vmem [shape: f32[1,32], index: 17, kind: input, shape index: {}]   ;;  %s3215_s22 = inlined_call_operand.vmem [shape: f32[8,128], index: 22, kind: output, shape index: {0}]  }
   0x1   :  { %3235 = sst [smem:[#allocation15_spill]] %s3192_s0  ;;  %1794 = vrcp.f32 %v1819_v2  ;;  %v347_v52 = vld [vmem:[%s3201_s10 + $0x70] sm:$0xff]  ;;  %v348_v53 = vld [vmem:[%s3201_s10 + $0x78] sm:$0xff]  ;;  %v345_v54 = vld [vmem:[%s3201_s10 + $0x60] sm:$0xff]  ;;  %vm474_vm11 = vcmask 31744  }
   0x2   :  { %3236 = sst [smem:[#allocation16_spill]] %s3193_s4  ;;  %366 = vmatpush.msra.mxu2 %v347_v52  ;;  %386 = vmatpush.msra.mxu3 %v348_v53  ;;  %v346_v55 = vld [vmem:[%s3201_s10 + $0x68] sm:$0xff]  ;;  %v343_v56 = vld [vmem:[%s3201_s10 + $0x50] sm:$0xff]  ;;  %v344_v57 = vld [vmem:[%s3201_s10 + $0x58] sm:$0xff] }
   0x3   :  { %3237 = sst [smem:[#allocation17_spill]] %s3194_s5  ;;  %v341_v58 = vld [vmem:[%s3201_s10 + $0x40] sm:$0xff]  ;;  %v342_v59 = vld [vmem:[%s3201_s10 + $0x48] sm:$0xff]  ;;  %v339_v60 = vld [vmem:[%s3201_s10 + $0x30] sm:$0xff]  ;;  %s1825_s5 = smov 32  }
   0x4   :  { %3238 = sst [smem:[#allocation18_spill]] %s3195_s7  ;;  %367 = vmatpush.msra.mxu2 %v345_v54  ;;  %387 = vmatpush.msra.mxu3 %v346_v55  ;;  %v340_v61 = vld [vmem:[%s3201_s10 + $0x38] sm:$0xff]  ;;  %v337_v63 = vld [vmem:[%s3201_s10 + $0x20] sm:$0xff]  ;;  %v335_v2 = vld [vmem:[%s3201_s10 + $0x10] sm:$0xff]  ;;  %s1821_s7 = smov 4  }
   0x5   :  { %3239 = sst [smem:[#allocation19_spill]] %s3196_s6  ;;  %v2123_v54 = vld [vmem:[%s3205_s20 + $0x1c0] sm:$0xff] }
   0x6   :  { %3240 = sst [smem:[#allocation20_spill]] %s3197_s8  ;;  %368 = vmatpush.msra.mxu2 %v343_v56  ;;  %388 = vmatpush.msra.mxu3 %v344_v57  ;;  %v2130_v56 = vld [vmem:[%s3205_s20 + $0x1c8] sm:$0xff]  ;;  %v2135_v57 = vld [vmem:[%s3205_s20 + $0x1d0] sm:$0xff] }
   0x7   :  { %3241 = sst [smem:[#allocation21_spill]] %s3198_s12  ;;  %v1795_v3 = vpop.eup %1794 }
   0x8   :  { %3242 = sst [smem:[#allocation22_spill]] %s3199_s9  ;;  %v212_v4 = vmul.f32 32.0, %v1795_v3  ;;  %vm216_vm1 = vweird.f32 %v1795_v3  ;;  %369 = vmatpush.msra.mxu2 %v341_v58  ;;  %389 = vmatpush.msra.mxu3 %v342_v59  ;;  %v2144_v58 = vld [vmem:[%s3205_s20 + $0x180] sm:$0xff]  ;;  %v2152_v59 = vld [vmem:[%s3205_s20 + $0x188] sm:$0xff] }
   0x9   :  { %s3243_s24 = sld [smem:[#allocation15_spill]] }
   0xa   :  { %v213_v5 = vsub.f32 1.0, %v212_v4  ;;  %s3244_s4 = sld [smem:[#allocation19_spill]]  ;;  %370 = vmatpush.msra.mxu2 %v339_v60  ;;  %390 = vmatpush.msra.mxu3 %v340_v61  ;;  %v2157_v60 = vld [vmem:[%s3205_s20 + $0x190] sm:$0xff]  ;;  %v2164_v61 = vld [vmem:[%s3205_s20 + $0x140] sm:$0xff] }
   0xb   :  { %s3245_s0 = sld [smem:[#allocation20_spill]] }
   0xc   :  { %v214_v6 = vmul.f32 %v1795_v3, %v213_v5  ;;  %s3246_s25 = sld [smem:[#allocation21_spill]]  ;;  %371 = vmatpush.msra.mxu2 %v337_v63  ;;  %v333_v5 = vld [vmem:[%s3201_s10] sm:$0xff]  ;;  %v2175_v63 = vld [vmem:[%s3205_s20 + $0x150] sm:$0xff] }
   0xd   :  { %s3247_s6 = sld [smem:[#allocation16_spill]] }
   0xe   :  { %v215_v7 = vadd.f32 %v1795_v3, %v214_v6  ;;  %s3248_s26 = sld [smem:[#allocation17_spill]]  ;;  %372 = vmatpush.msra.mxu2 %v335_v2  ;;  %v334_v6 = vld [vmem:[%s3201_s10 + $0x8] sm:$0xff]  ;;  %v2193_v2 = vld [vmem:[%s3205_s20 + $0x110] sm:$0xff] }
   0xf   :  { %v206_v0 = vld [vmem:[%s3243_s24] sm:$0xff]  ;;  %s3249_s8 = sld [smem:[#allocation18_spill]] }
  0x10   :  { %v208_v1 = vsel %vm207_vm0, %v206_v0, 0.0  ;;  %v217_v8 = vsel %vm216_vm1, %v1795_v3, %v215_v7  ;;  %v250_v14 = vld [vmem:[%s3244_s4 + $0x18] sm:$0xff]  ;;  %v249_v15 = vld [vmem:[%s3244_s4 + $0x10] sm:$0xff]  ;;  %v248_v16 = vld [vmem:[%s3244_s4 + $0x8] sm:$0xff]  ;;  %s3251_s28 = sld [smem:[#allocation22_spill]]  ;;  %373 = vmatpush.msra.mxu2 %v333_v5 }
  0x11   :  { %209 = vadd.xlane.f32.xlu0 %v208_v1  ;;  %270 = vmatpush.msra.mxu0 %v250_v14  ;;  %v247_v17 = vld [vmem:[%s3244_s4] sm:$0xff]  ;;  %v285_v18 = vld [vmem:[%s3245_s0 + $0x38] sm:$0xff]  ;;  %v284_v20 = vld [vmem:[%s3245_s0 + $0x30] sm:$0xff]  ;;  %s1826_s4 = smov 28  }
  0x12   :  { %v406_v19 = vld [vmem:[%s3246_s25 + $0x38] sm:$0xff]  ;;  %302 = vmatpush.msra.mxu1 %v285_v18  ;;  %v405_v21 = vld [vmem:[%s3246_s25 + $0x30] sm:$0xff]  ;;  %v283_v22 = vld [vmem:[%s3245_s0 + $0x28] sm:$0xff] }
  0x13   :  { %271 = vmatpush.msra.mxu0 %v249_v15  ;;  %v404_v23 = vld [vmem:[%s3246_s25 + $0x28] sm:$0xff]  ;;  %v282_v26 = vld [vmem:[%s3245_s0 + $0x20] sm:$0xff]  ;;  %v281_v29 = vld [vmem:[%s3245_s0 + $0x18] sm:$0xff] }
  0x14   :  { %303 = vmatpush.msra.mxu1 %v284_v20  ;;  %v403_v27 = vld [vmem:[%s3246_s25 + $0x20] sm:$0xff]  ;;  %v402_v30 = vld [vmem:[%s3246_s25 + $0x18] sm:$0xff]  ;;  %v280_v31 = vld [vmem:[%s3245_s0 + $0x10] sm:$0xff] }
  0x15   :  { %272 = vmatpush.msra.mxu0 %v248_v16  ;;  %v401_v32 = vld [vmem:[%s3246_s25 + $0x10] sm:$0xff]  ;;  %v1786_v39 = vld [vmem:[%s3247_s6] ss:$0 sm:$0xff]  ;;  %v279_v45 = vld [vmem:[%s3245_s0 + $0x8] sm:$0xff]  ;;  %s1822_s6 = smov 64  }
  0x16   :  { %304 = vmatpush.msra.mxu1 %v283_v22  ;;  %v1787_v42 = vld [vmem:[%s3248_s26] ss:$0 sm:$0xff]  ;;  %v400_v46 = vld [vmem:[%s3246_s25 + $0x8] sm:$0xff]  ;;  %v336_v3 = vld [vmem:[%s3201_s10 + $0x18] sm:$0xff] }
  0x17   :  { %273 = vmatpush.msra.mxu0 %v247_v17  ;;  %v278_v47 = vld [vmem:[%s3245_s0] sm:$0xff]  ;;  %v2213_v5 = vld [vmem:[%s3205_s20 + $0xd0] sm:$0xff] }
  0x18   :  { %305 = vmatpush.msra.mxu1 %v282_v26  ;;  %v399_v48 = vld [vmem:[%s3246_s25] sm:$0xff] }
  0x19   :  { %419 = vmatpush.msrb.mxu0 %v406_v19  ;;  %v1788_v49 = vld [vmem:[%s3249_s8] ss:$0 sm:$0xff] }
  0x1a   :  { %306 = vmatpush.msra.mxu1 %v281_v29  ;;  %v1789_v62 = vld [vmem:[%s3251_s28] ss:$0 sm:$0xff] }
  0x1b   :  { %420 = vmatpush.msrb.mxu0 %v405_v21 }
  0x1c   :  { %307 = vmatpush.msra.mxu1 %v280_v31 }
  0x1d   :  { %421 = vmatpush.msrb.mxu0 %v404_v23  ;;  %v349_v23 = vld [vmem:[%s3203_s11] sm:$0x3]  ;;  %s1823_s11 = smov 124  }
  0x1e   :  { %308 = vmatpush.msra.mxu1 %v279_v45  ;;  %v351_v26 = vperm.slane %v349_v23, 0 }
  0x1f   :  { %422 = vmatpush.msrb.mxu0 %v403_v27 }
  0x20   :  { %309 = vmatpush.msra.mxu1 %v278_v47 }
  0x21   :  { %423 = vmatpush.msrb.mxu0 %v402_v30 }
  0x23   :  { %424 = vmatpush.msrb.mxu0 %v401_v32 }
  0x25   :  { %425 = vmatpush.msrb.mxu0 %v400_v46 }
  0x27   :  { %426 = vmatpush.msrb.mxu0 %v399_v48 }
  0x84   :  { %v210_v9 = vpop.xlane.xlu0 %209 }
  0x85   :  { %v218_v10 = vmul.f32 %v217_v8, %v210_v9 }
  0x87   :  { %v219_v11 = vsub.f32 %v206_v0, %v218_v10  ;;  %v338_v0 = vld [vmem:[%s3201_s10 + $0x28] sm:$0xff] }
  0x88   :  { %391 = vmatpush.msra.mxu3 %v338_v0  ;;  %v2182_v0 = vld [vmem:[%s3205_s20 + $0x100] sm:$0xff] }
  0x89   :  { %v220_v12 = vmul.f32 %v219_v11, %v219_v11 }
  0x8a   :  { %392 = vmatpush.msra.mxu3 %v336_v3  ;;  %v2201_v3 = vld [vmem:[%s3205_s20 + $0xc0] sm:$0xff] }
  0x8b   :  { %v221_v13 = vsel %vm207_vm0, %v220_v12, 0.0 }
  0x8c   :  { %222 = vadd.xlane.f32.xlu0 %v221_v13  ;;  %393 = vmatpush.msra.mxu3 %v334_v6  ;;  %v2222_v6 = vld [vmem:[%s3205_s20 + $0x80] sm:$0xff] }
  0xff   :  { %v223_v24 = vpop.xlane.xlu0 %222 }
 0x100   :  { %v224_v25 = vmul.f32 %v223_v24, %v217_v8  ;;  %v431_v8 = vld [vmem:[%s3202_s3] sm:$0xff]  ;;  %v352_v24 = vperm.slane %v349_v23, 1  ;;  %v2327_v23 = vld [vmem:[%s3205_s20 + $0x168] sm:$0xff] }
 0x101   :  { %433 = vrot.lane.b32.xlu1 %v431_v8, %s1820_s29  ;;  %v2235_v8 = vld [vmem:[%s3205_s20 + $0x90] sm:$0xff] }
 0x102   :  { %v225_v28 = vadd.f32 1e-05, %v224_v25 }
 0x104   :  { %1796 = vrsqrt.f32 %v225_v28  ;;  %vm232_vm3 = vweird.f32 %v225_v28 }
 0x10a   :  { %v1797_v33 = vpop.eup %1796 }
 0x10b   :  { %v227_v34 = vmul.f32 %v1797_v33, %v225_v28  ;;  %vm233_vm2 = vweird.f32 %v1797_v33 }
 0x10c   :  { %vm234_vm4 = vmor %vm232_vm3, %vm233_vm2 }
 0x10d   :  { %v228_v35 = vmul.f32 %v1797_v33, %v227_v34 }
 0x10f   :  { %v229_v36 = vmul.f32 0.5, %v228_v35 }
 0x111   :  { %v230_v37 = vsub.f32 1.5, %v229_v36 }
 0x113   :  { %v231_v38 = vmul.f32 %v1797_v33, %v230_v37 }
 0x115   :  { %v235_v40 = vsel %vm234_vm4, %v1797_v33, %v231_v38 }
 0x116   :  { %v236_v41 = vmul.f32 %v235_v40, %v219_v11  ;;  %v203_v40 = vld [vmem:[%s3204_s21 + $0x8] sm:$0xff] }
 0x117   :  { %532 = vst [vmem:[#allocation1 + $0x10] ss:$2 sm:$0xff] %v203_v40  ;;  %v2412_v40 = vld [vmem:[%s3205_s20 + $0x20] sm:$0xff] }
 0x118   :  { %v241_v43 = vmul.f32 %v1786_v39, %v236_v41  ;;  %v202_v39 = vld [vmem:[%s3204_s21] sm:$0xff]  ;;  %v204_v41 = vld [vmem:[%s3204_s21 + $0x10] sm:$0xff] }
 0x119   :  { %530 = vst [vmem:[#allocation1] ss:$2 sm:$0xff] %v202_v39  ;;  %v2406_v39 = vld [vmem:[%s3205_s20 + $0x70] sm:$0xff] }
 0x11a   :  { %v246_v44 = vadd.f32 %v1787_v42, %v241_v43  ;;  %v205_v42 = vld [vmem:[%s3204_s21 + $0x18] sm:$0xff]  ;;  %534 = vst [vmem:[#allocation1 + $0x20] ss:$2 sm:$0xff] %v204_v41  ;;  %v2417_v41 = vld [vmem:[%s3205_s20 + $0x28] sm:$0xff] }
 0x11b   :  { %536 = vst [vmem:[#allocation1 + $0x30] ss:$2 sm:$0xff] %v205_v42  ;;  %v2424_v42 = vld [vmem:[%s3205_s20 + $0x30] sm:$0xff] }
 0x11c   :  { %1716 = vmatmul.msk.f32.vlgmr.msra.gmra.mxu0 %vm207_vm0, %v246_v44 }
 0x11e   :  { %v539_v45 = vld.sshfl [vmem:[#allocation1 + $0x10] sm:$0xff pattern:$0x75316420] }
 0x11f   :  { %1729 = vmatpush.msk.msrb.mxu1 %vm477_vm10, %v539_v45  ;;  %v540_v45 = vld.sshfl [vmem:[#allocation1 + $0x18] sm:$0xff pattern:$0x75316420] }
 0x120   :  { %v537_v43 = vld.sshfl [vmem:[#allocation1] sm:$0xff pattern:$0x75316420]  ;;  %v538_v44 = vld.sshfl [vmem:[#allocation1 + $0x8] sm:$0xff pattern:$0x75316420] }
 0x121   :  { %1725 = vmatpush.msk.msrb.mxu3 %vm477_vm10, %v537_v43  ;;  %1727 = vmatpush.msk.msra.mxu0 %vm477_vm10, %v538_v44  ;;  %v541_v46 = vld.sshfl [vmem:[#allocation1 + $0x20] sm:$0xff pattern:$0x75316420]  ;;  %v542_v47 = vld.sshfl [vmem:[#allocation1 + $0x28] sm:$0xff pattern:$0x75316420] }
 0x122   :  { %v543_v48 = vld.sshfl [vmem:[#allocation1 + $0x30] sm:$0xff pattern:$0x75316420]  ;;  %v2435_v43 = vld [vmem:[%s3206_s18] sm:$0xf] }
 0x123   :  { %3255 = vst [vmem:[#allocation6_spill] sm:$0xff] %v2435_v43  ;;  %1721 = vmatpush.msk.msrb.mxu2 %vm477_vm10, %v2435_v43 }
 0x173   :  { %v434_v31 = vpop.permute.xlu1 %433 }
 0x199   :  { %v275_v50 = vpop.f32.mrf.mxu0 }
 0x19a   :  { %v2022_v51 = vadd.f32 %v1788_v49, %v275_v50 }
 0x19c   :  { %3250 = vst [vmem:[#allocation2_spill] sm:$0xff] %v2022_v51  ;;  %1717 = vmatmul.msk.f32.vlgmr.msra.gmra.mxu1 %vm290_vm5, %v2022_v51  ;;  %1720 = vmatmul.msk.f32.vlgmr.msrb.gmra.mxu0 %vm290_vm5, %v2022_v51  ;;  %v2917_v51 = vld [vmem:[%s3207_s19 + $0x70] sm:$0xff] }
 0x19d   :  { %1735 = vmatpush.msk.msrb.mxu0 %vm477_vm10, %v542_v47  ;;  %1737 = vmatpush.msk.msra.mxu1 %vm477_vm10, %v543_v48  ;;  %v197_v47 = vld [vmem:[%s3205_s20 + $0x1d8] sm:$0xff]  ;;  %3261 = vst [vmem:[#allocation12_spill] sm:$0xff] %v2917_v51 }
 0x19e   :  { %v189_v48 = vld [vmem:[%s3205_s20 + $0x198] sm:$0xff] }
 0x219   :  { %v311_v1 = vpop.f32.mrf.mxu1 }
 0x21a   :  { %v312_v4 = vadd.f32 %v1789_v62, %v311_v1  ;;  %v2170_v62 = vld [vmem:[%s3205_s20 + $0x148] sm:$0xff] }
 0x21b   :  { %v2188_v1 = vld [vmem:[%s3205_s20 + $0x108] sm:$0xff] }
 0x21c   :  { %v314_v7 = vsub.f32 0.0, %v312_v4 }
 0x21e   :  { %v315_v9 = vmul.f32 1.442695, %v314_v7  ;;  %v2230_v7 = vld [vmem:[%s3205_s20 + $0x88] sm:$0xff] }
 0x220   :  { %1798 = vpow2.f32 %v315_v9  ;;  %v2242_v9 = vld [vmem:[%s3205_s20 + $0x40] sm:$0xff] }
 0x226   :  { %v1799_v10 = vpop.eup %1798 }
 0x227   :  { %v317_v11 = vadd.f32 1.0, %v1799_v10  ;;  %v2248_v10 = vld [vmem:[%s3205_s20 + $0x48] sm:$0xff] }
 0x229   :  { %1800 = vrcp.f32 %v317_v11  ;;  %v329_v15 = vand.u32 2147483648, %v317_v11  ;;  %v327_v17 = vand.u32 2147483647, %v317_v11  ;;  %vm323_vm7 = vweird.f32 %v317_v11 }
 0x22b   :  { %v330_v19 = vor.u32 1.1754944e-38, %v329_v15  ;;  %vm328_vm9 = vcmp.eq.f32.partialorder %v327_v17, 8.507059e+37  ;;  %v2278_v15 = vld [vmem:[%s3205_s20 + $0x1e0] sm:$0xff]  ;;  %v2289_v17 = vld [vmem:[%s3205_s20 + $0x1f0] sm:$0xff] }
 0x22f   :  { %v1801_v12 = vpop.eup %1800 }
 0x230   :  { %v319_v13 = vmul.f32 %v1801_v12, %v317_v11  ;;  %vm324_vm6 = vweird.f32 %v1801_v12  ;;  %v2253_v11 = vld [vmem:[%s3205_s20 + $0x50] sm:$0xff] }
 0x231   :  { %vm325_vm8 = vmor %vm323_vm7, %vm324_vm6 }
 0x232   :  { %v320_v14 = vsub.f32 1.0, %v319_v13  ;;  %v2266_v13 = vld [vmem:[%s3205_s20 + $0x8] sm:$0xff] }
 0x234   :  { %v321_v16 = vmul.f32 %v1801_v12, %v320_v14  ;;  %v2271_v14 = vld [vmem:[%s3205_s20 + $0x10] sm:$0xff] }
 0x236   :  { %v322_v18 = vadd.f32 %v1801_v12, %v321_v16  ;;  %v2283_v16 = vld [vmem:[%s3205_s20 + $0x1e8] sm:$0xff] }
 0x238   :  { %v326_v20 = vsel %vm325_vm8, %v1801_v12, %v322_v18  ;;  %v2260_v12 = vld [vmem:[%s3205_s20] sm:$0xff] }
 0x239   :  { %v331_v21 = vsel %vm328_vm9, %v330_v19, %v326_v20  ;;  %v2300_v19 = vld [vmem:[%s3205_s20 + $0x1a0] sm:$0xff]  ;;  %v2305_v20 = vld [vmem:[%s3205_s20 + $0x1a8] sm:$0xff] }
 0x23a   :  { %v332_v22 = vmul.f32 %v331_v21, %v312_v4  ;;  %v2208_v4 = vld [vmem:[%s3205_s20 + $0xc8] sm:$0xff]  ;;  %v2313_v21 = vld [vmem:[%s3205_s20 + $0x1b0] sm:$0xff] }
 0x23c   :  { %1718 = vmatmul.msk.f32.vlgmr.msra.gmra.mxu2 %vm290_vm5, %v332_v22  ;;  %1719 = vmatmul.msk.f32.vlgmr.msra.gmra.mxu3 %vm290_vm5, %v332_v22  ;;  %v2322_v22 = vld [vmem:[%s3205_s20 + $0x160] sm:$0xff] }
 0x23d   :  { %1733 = vmatpush.msk.msra.mxu3 %vm477_vm10, %v541_v46  ;;  %1723 = vmatpush.msk.msra.mxu2 %vm477_vm10, %v2435_v43  ;;  %v544_v46 = vld.sshfl [vmem:[#allocation1 + $0x38] sm:$0xff pattern:$0x75316420]  ;;  %v2941_v43 = vld [vmem:[%s3207_s19 + $0x30] sm:$0xff] }
 0x2bf   :  { %v395_v25 = vpop.f32.mrf.mxu3  ;;  %v375_v28 = vpop.f32.mrf.mxu2 }
 0x2c0   :  { %v2087_v27 = vadd.f32 %v395_v25, %v352_v24  ;;  %v2090_v29 = vadd.f32 %v375_v28, %v351_v26  ;;  %v2334_v24 = vld [vmem:[%s3205_s20 + $0x170] sm:$0xff]  ;;  %v2340_v25 = vld [vmem:[%s3205_s20 + $0x120] sm:$0xff]  ;;  %v2345_v26 = vld [vmem:[%s3205_s20 + $0x128] sm:$0xff] }
 0x2c1   :  { %v2352_v28 = vld [vmem:[%s3205_s20 + $0x130] sm:$0xff] }
 0x2c2   :  { %3252 = vst [vmem:[#allocation3_spill] sm:$0xff] %v2087_v27  ;;  %438 = vrot.lane.b32.xlu1 %v2087_v27, %s1821_s7  ;;  %v398_v30 = vmul.f32 0.25, %v2090_v29  ;;  %v436_v32 = vadd.f32 %v434_v31, %v2087_v27 }
 0x2c3   :  { %3253 = vst [vmem:[#allocation4_spill] sm:$0xff] %v2090_v29 }
 0x2ca   :  { %722 = vrot.lane.b32.xlu1 %v398_v30, %s1822_s6  ;;  %v2358_v30 = vld [vmem:[%s3205_s20 + $0xe0] sm:$0xff] }
 0x334   :  { %v439_v33 = vpop.permute.xlu1 %438 }
 0x335   :  { %v2095_v34 = vmax.f32 %v436_v32, %v439_v33  ;;  %v2370_v32 = vld [vmem:[%s3205_s20 + $0xf0] sm:$0xff]  ;;  %v2376_v33 = vld [vmem:[%s3205_s20 + $0xa0] sm:$0xff] }
 0x337   :  { %3254 = vst [vmem:[#allocation5_spill] sm:$0xff] %v2095_v34  ;;  %v449_v35 = vsub.f32 %v2087_v27, %v2095_v34  ;;  %443 = vrot.lane.b32.xlu2 %v2095_v34, %s1823_s11  ;;  %v2922_v34 = vld [vmem:[%s3207_s19 + $0x78] sm:$0xff] }
 0x339   :  { %v450_v36 = vadd.f32 %v449_v35, %v434_v31  ;;  %v2363_v31 = vld [vmem:[%s3205_s20 + $0xe8] sm:$0xff] }
 0x33a   :  { %v2381_v35 = vld [vmem:[%s3205_s20 + $0xa8] sm:$0xff] }
 0x33b   :  { %v451_v37 = vmul.f32 1.442695, %v450_v36  ;;  %v2388_v36 = vld [vmem:[%s3205_s20 + $0xb0] sm:$0xff] }
 0x33c   :  { %v2293_v18 = vpop.permute.xlu1 %722 }
 0x33d   :  { %1802 = vpow2.f32 %v451_v37  ;;  %v2394_v37 = vld [vmem:[%s3205_s20 + $0x60] sm:$0xff] }
 0x343   :  { %v1803_v38 = vpop.eup %1802 }
 0x344   :  { %502 = vrot.lane.b32.xlu0 %v1803_v38, %s1824_s30  ;;  %v2399_v38 = vld [vmem:[%s3205_s20 + $0x68] sm:$0xff] }
 0x391   :  { %v444_v49 = vpop.permute.xlu2 %443 }
 0x392   :  { %v446_v50 = vsub.f32 %v2087_v27, %v444_v49  ;;  %v181_v49 = vld [vmem:[%s3205_s20 + $0x158] sm:$0xff]  ;;  %v2929_v27 = vld [vmem:[%s3207_s19 + $0x20] sm:$0xff] }
 0x394   :  { %v447_v52 = vmul.f32 1.442695, %v446_v50  ;;  %v173_v50 = vld [vmem:[%s3205_s20 + $0x118] sm:$0xff] }
 0x396   :  { %1804 = vpow2.f32 %v447_v52  ;;  %v165_v52 = vld [vmem:[%s3205_s20 + $0xd8] sm:$0xff] }
 0x39c   :  { %v1805_v53 = vpop.eup %1804 }
 0x39d   :  { %472 = vrot.lane.b32.xlu2 %v1805_v53, %s1822_s6  ;;  %v157_v53 = vld [vmem:[%s3205_s20 + $0x98] sm:$0xff] }
 0x3b6   :  { %v2125_v55 = vpop.permute.xlu0 %502 }
 0x3b7   :  { %1726 = vmatmul.msk.f32.vlgmr.msrb.gmra.mxu3 %vm474_vm11, %v2125_v55  ;;  %1728 = vmatmul.msk.f32.vlgmr.msra.gmra.mxu0 %vm474_vm11, %v2125_v55 }
 0x3b8   :  { %1730 = vmatmul.msk.f32.vlgmr.msrb.gmra.mxu1 %vm474_vm11, %v2125_v55  ;;  %734 = vmatpush.msrb.mxu3 %v2123_v54 }
 0x3b9   :  { %754 = vmatpush.msra.mxu0 %v2130_v56  ;;  %774 = vmatpush.msrb.mxu1 %v2135_v57 }
 0x3ba   :  { %735 = vmatpush.msrb.mxu3 %v2144_v58 }
 0x3bb   :  { %755 = vmatpush.msra.mxu0 %v2152_v59  ;;  %775 = vmatpush.msrb.mxu1 %v2157_v60 }
 0x3bc   :  { %736 = vmatpush.msrb.mxu3 %v2164_v61 }
 0x3bd   :  { %756 = vmatpush.msra.mxu0 %v2170_v62  ;;  %776 = vmatpush.msrb.mxu1 %v2175_v63 }
 0x3be   :  { %737 = vmatpush.msrb.mxu3 %v2182_v0 }
 0x3bf   :  { %757 = vmatpush.msra.mxu0 %v2188_v1  ;;  %777 = vmatpush.msrb.mxu1 %v2193_v2 }
 0x3c0   :  { %1734 = vmatmul.msk.f32.vlgmr.msra.gmra.mxu3 %vm474_vm11, %v2125_v55  ;;  %1736 = vmatmul.msk.f32.vlgmr.msrb.gmra.mxu0 %vm474_vm11, %v2125_v55 }
 0x3c1   :  { %1738 = vmatmul.msk.f32.vlgmr.msra.gmra.mxu1 %vm474_vm11, %v2125_v55  ;;  %738 = vmatpush.msrb.mxu3 %v2201_v3 }
 0x3c2   :  { %758 = vmatpush.msra.mxu0 %v2208_v4  ;;  %778 = vmatpush.msrb.mxu1 %v2213_v5 }
 0x3c3   :  { %739 = vmatpush.msrb.mxu3 %v2222_v6 }
 0x3c4   :  { %759 = vmatpush.msra.mxu0 %v2230_v7  ;;  %779 = vmatpush.msrb.mxu1 %v2235_v8 }
 0x3c5   :  { %740 = vmatpush.msrb.mxu3 %v2242_v9 }
 0x3c6   :  { %760 = vmatpush.msra.mxu0 %v2248_v10  ;;  %780 = vmatpush.msrb.mxu1 %v2253_v11 }
 0x3c7   :  { %741 = vmatpush.msrb.mxu3 %v2260_v12 }
 0x3c8   :  { %761 = vmatpush.msra.mxu0 %v2266_v13  ;;  %781 = vmatpush.msrb.mxu1 %v2271_v14 }
 0x3c9   :  { %814 = vmatpush.msra.mxu3 %v2278_v15  ;;  %1742 = vmatmul.msk.f32.vlgmr.msra.gmra.mxu0 %vm290_vm5, %v2293_v18 }
 0x3ca   :  { %834 = vmatpush.msrb.mxu0 %v2283_v16  ;;  %854 = vmatpush.msra.mxu1 %v2289_v17 }
 0x3cb   :  { %1741 = vmatmul.msk.f32.vlgmr.msrb.gmra.mxu3 %vm290_vm5, %v2293_v18  ;;  %1743 = vmatmul.msk.f32.vlgmr.msrb.gmra.mxu1 %vm290_vm5, %v2293_v18 }
 0x3cc   :  { %815 = vmatpush.msra.mxu3 %v2300_v19  ;;  %835 = vmatpush.msrb.mxu0 %v2305_v20 }
 0x3cd   :  { %855 = vmatpush.msra.mxu1 %v2313_v21 }
 0x3ce   :  { %816 = vmatpush.msra.mxu3 %v2322_v22  ;;  %836 = vmatpush.msrb.mxu0 %v2327_v23 }
 0x3cf   :  { %856 = vmatpush.msra.mxu1 %v2334_v24 }
 0x3d0   :  { %817 = vmatpush.msra.mxu3 %v2340_v25  ;;  %837 = vmatpush.msrb.mxu0 %v2345_v26 }
 0x3d1   :  { %857 = vmatpush.msra.mxu1 %v2352_v28 }
 0x3d2   :  { %818 = vmatpush.msra.mxu3 %v2358_v30  ;;  %838 = vmatpush.msrb.mxu0 %v2363_v31 }
 0x3d3   :  { %858 = vmatpush.msra.mxu1 %v2370_v32 }
 0x3d4   :  { %819 = vmatpush.msra.mxu3 %v2376_v33  ;;  %839 = vmatpush.msrb.mxu0 %v2381_v35 }
 0x3d5   :  { %859 = vmatpush.msra.mxu1 %v2388_v36 }
 0x3d6   :  { %820 = vmatpush.msra.mxu3 %v2394_v37  ;;  %840 = vmatpush.msrb.mxu0 %v2399_v38 }
 0x3d7   :  { %860 = vmatpush.msra.mxu1 %v2406_v39 }
 0x3d8   :  { %821 = vmatpush.msra.mxu3 %v2412_v40  ;;  %841 = vmatpush.msrb.mxu0 %v2417_v41 }
 0x3d9   :  { %861 = vmatpush.msra.mxu1 %v2424_v42  ;;  %1745 = vmatmul.msk.f32.vlgmr.msra.gmra.mxu3 %vm290_vm5, %v2293_v18 }
 0x3da   :  { %1746 = vmatmul.msk.f32.vlgmr.msrb.gmra.mxu0 %vm290_vm5, %v2293_v18  ;;  %1747 = vmatmul.msk.f32.vlgmr.msra.gmra.mxu1 %vm290_vm5, %v2293_v18 }
 0x3db   :  { %897 = vmatpush.msrb.mxu3 %v2123_v54  ;;  %917 = vmatpush.msra.mxu0 %v2130_v56  ;;  %v149_v54 = vld [vmem:[%s3205_s20 + $0x58] sm:$0xff] }
 0x3dc   :  { %937 = vmatpush.msrb.mxu1 %v2135_v57  ;;  %v141_v56 = vld [vmem:[%s3205_s20 + $0x18] sm:$0xff] }
 0x3dd   :  { %898 = vmatpush.msrb.mxu3 %v2144_v58  ;;  %918 = vmatpush.msra.mxu0 %v2152_v59  ;;  %v201_v57 = vld [vmem:[%s3205_s20 + $0x1f8] sm:$0xff] }
 0x3de   :  { %938 = vmatpush.msrb.mxu1 %v2157_v60  ;;  %v185_v58 = vld [vmem:[%s3205_s20 + $0x178] sm:$0xff] }
 0x3df   :  { %899 = vmatpush.msrb.mxu3 %v2164_v61  ;;  %919 = vmatpush.msra.mxu0 %v2170_v62  ;;  %v177_v59 = vld [vmem:[%s3205_s20 + $0x138] sm:$0xff] }
 0x3e0   :  { %939 = vmatpush.msrb.mxu1 %v2175_v63  ;;  %v169_v60 = vld [vmem:[%s3205_s20 + $0xf8] sm:$0xff] }
 0x3e1   :  { %900 = vmatpush.msrb.mxu3 %v2182_v0  ;;  %920 = vmatpush.msra.mxu0 %v2188_v1  ;;  %v161_v61 = vld [vmem:[%s3205_s20 + $0xb8] sm:$0xff]  ;;  %v2573_v0 = vld [vmem:[%s3207_s19 + $0x1c0] sm:$0xff]  ;;  %v2578_v1 = vld [vmem:[%s3207_s19 + $0x1c8] sm:$0xff] }
 0x3e2   :  { %940 = vmatpush.msrb.mxu1 %v2193_v2  ;;  %v153_v62 = vld [vmem:[%s3205_s20 + $0x78] sm:$0xff]  ;;  %v2583_v2 = vld [vmem:[%s3207_s19 + $0x1d0] sm:$0xff] }
 0x3e3   :  { %901 = vmatpush.msrb.mxu3 %v2201_v3  ;;  %921 = vmatpush.msra.mxu0 %v2208_v4  ;;  %v145_v63 = vld [vmem:[%s3205_s20 + $0x38] sm:$0xff]  ;;  %v2595_v4 = vld [vmem:[%s3207_s19 + $0x180] sm:$0xff] }
 0x3e4   :  { %941 = vmatpush.msrb.mxu1 %v2213_v5  ;;  %v2590_v3 = vld [vmem:[%s3207_s19 + $0x1d8] sm:$0xff]  ;;  %v2600_v5 = vld [vmem:[%s3207_s19 + $0x188] sm:$0xff] }
 0x3e5   :  { %902 = vmatpush.msrb.mxu3 %v2222_v6  ;;  %922 = vmatpush.msra.mxu0 %v2230_v7  ;;  %v2607_v6 = vld [vmem:[%s3207_s19 + $0x190] sm:$0xff]  ;;  %v2612_v7 = vld [vmem:[%s3207_s19 + $0x198] sm:$0xff] }
 0x3e6   :  { %942 = vmatpush.msrb.mxu1 %v2235_v8  ;;  %v2617_v8 = vld [vmem:[%s3207_s19 + $0x140] sm:$0xff] }
 0x3e7   :  { %903 = vmatpush.msrb.mxu3 %v2242_v9  ;;  %923 = vmatpush.msra.mxu0 %v2248_v10  ;;  %v2624_v9 = vld [vmem:[%s3207_s19 + $0x148] sm:$0xff]  ;;  %v2629_v10 = vld [vmem:[%s3207_s19 + $0x150] sm:$0xff] }
 0x3e8   :  { %943 = vmatpush.msrb.mxu1 %v2253_v11  ;;  %v2634_v11 = vld [vmem:[%s3207_s19 + $0x158] sm:$0xff] }
 0x3e9   :  { %904 = vmatpush.msrb.mxu3 %v2260_v12  ;;  %924 = vmatpush.msra.mxu0 %v2266_v13  ;;  %v2641_v12 = vld [vmem:[%s3207_s19 + $0x100] sm:$0xff]  ;;  %v2646_v13 = vld [vmem:[%s3207_s19 + $0x108] sm:$0xff] }
 0x3ea   :  { %944 = vmatpush.msrb.mxu1 %v2271_v14  ;;  %1749 = vmatmul.msk.f32.vlgmr.msrb.gmra.mxu3 %vm290_vm5, %v2090_v29  ;;  %v2653_v14 = vld [vmem:[%s3207_s19 + $0x110] sm:$0xff] }
 0x3eb   :  { %1750 = vmatmul.msk.f32.vlgmr.msra.gmra.mxu0 %vm290_vm5, %v2090_v29  ;;  %1751 = vmatmul.msk.f32.vlgmr.msrb.gmra.mxu1 %vm290_vm5, %v2090_v29 }
 0x3ec   :  { %977 = vmatpush.msra.mxu3 %v2278_v15  ;;  %997 = vmatpush.msrb.mxu0 %v2283_v16  ;;  %v2658_v15 = vld [vmem:[%s3207_s19 + $0x118] sm:$0xff]  ;;  %v2669_v16 = vld [vmem:[%s3207_s19 + $0xc0] sm:$0xff] }
 0x3ed   :  { %1017 = vmatpush.msra.mxu1 %v2289_v17  ;;  %v2674_v17 = vld [vmem:[%s3207_s19 + $0xc8] sm:$0xff] }
 0x3ee   :  { %978 = vmatpush.msra.mxu3 %v2300_v19  ;;  %998 = vmatpush.msrb.mxu0 %v2305_v20  ;;  %v2679_v19 = vld [vmem:[%s3207_s19 + $0xd0] sm:$0xff]  ;;  %v2686_v20 = vld [vmem:[%s3207_s19 + $0xd8] sm:$0xff] }
 0x3ef   :  { %1018 = vmatpush.msra.mxu1 %v2313_v21  ;;  %v2691_v21 = vld [vmem:[%s3207_s19 + $0x80] sm:$0xff] }
 0x3f0   :  { %979 = vmatpush.msra.mxu3 %v2322_v22  ;;  %999 = vmatpush.msrb.mxu0 %v2327_v23  ;;  %v2696_v22 = vld [vmem:[%s3207_s19 + $0x88] sm:$0xff]  ;;  %v2703_v23 = vld [vmem:[%s3207_s19 + $0x90] sm:$0xff] }
 0x3f1   :  { %1019 = vmatpush.msra.mxu1 %v2334_v24  ;;  %v2708_v24 = vld [vmem:[%s3207_s19 + $0x98] sm:$0xff] }
 0x3f2   :  { %980 = vmatpush.msra.mxu3 %v2340_v25  ;;  %1000 = vmatpush.msrb.mxu0 %v2345_v26  ;;  %v2713_v25 = vld [vmem:[%s3207_s19 + $0x40] sm:$0xff]  ;;  %v2720_v26 = vld [vmem:[%s3207_s19 + $0x48] sm:$0xff] }
 0x3f3   :  { %1020 = vmatpush.msra.mxu1 %v2352_v28  ;;  %v2725_v28 = vld [vmem:[%s3207_s19 + $0x50] sm:$0xff] }
 0x3f4   :  { %981 = vmatpush.msra.mxu3 %v2358_v30  ;;  %1001 = vmatpush.msrb.mxu0 %v2363_v31  ;;  %v2730_v30 = vld [vmem:[%s3207_s19 + $0x58] sm:$0xff]  ;;  %v2741_v31 = vld [vmem:[%s3207_s19] sm:$0xff] }
 0x3f5   :  { %1021 = vmatpush.msra.mxu1 %v2370_v32  ;;  %v2746_v32 = vld [vmem:[%s3207_s19 + $0x8] sm:$0xff] }
 0x3f6   :  { %982 = vmatpush.msra.mxu3 %v2376_v33  ;;  %1002 = vmatpush.msrb.mxu0 %v2381_v35  ;;  %v2751_v33 = vld [vmem:[%s3207_s19 + $0x10] sm:$0xff]  ;;  %v2758_v35 = vld [vmem:[%s3207_s19 + $0x18] sm:$0xff] }
 0x3f7   :  { %1022 = vmatpush.msra.mxu1 %v2388_v36  ;;  %v473_v44 = vpop.permute.xlu2 %472  ;;  %v2763_v36 = vld [vmem:[%s3207_s19 + $0x1e0] sm:$0xff] }
 0x3f8   :  { %983 = vmatpush.msra.mxu3 %v2394_v37  ;;  %1003 = vmatpush.msrb.mxu0 %v2399_v38  ;;  %v2768_v37 = vld [vmem:[%s3207_s19 + $0x1e8] sm:$0xff]  ;;  %v2775_v38 = vld [vmem:[%s3207_s19 + $0x1f0] sm:$0xff] }
 0x3f9   :  { %1023 = vmatpush.msra.mxu1 %v2406_v39  ;;  %1722 = vmatmul.msk.f32.vlgmr.msrb.gmra.mxu2 %vm474_vm11, %v473_v44  ;;  %v2780_v39 = vld [vmem:[%s3207_s19 + $0x1f8] sm:$0xff] }
 0x3fa   :  { %984 = vmatpush.msra.mxu3 %v2412_v40  ;;  %1004 = vmatpush.msrb.mxu0 %v2417_v41  ;;  %v2785_v40 = vld [vmem:[%s3207_s19 + $0x1a0] sm:$0xff]  ;;  %v2792_v41 = vld [vmem:[%s3207_s19 + $0x1a8] sm:$0xff]  ;;  %v2802_v44 = vld [vmem:[%s3207_s19 + $0x1b8] sm:$0xff] }
 0x3fb   :  { %1024 = vmatpush.msra.mxu1 %v2424_v42  ;;  %1753 = vmatmul.msk.f32.vlgmr.msra.gmra.mxu3 %vm290_vm5, %v2090_v29  ;;  %v2797_v42 = vld [vmem:[%s3207_s19 + $0x1b0] sm:$0xff] }
 0x3fc   :  { %1754 = vmatmul.msk.f32.vlgmr.msrb.gmra.mxu0 %vm290_vm5, %v2090_v29  ;;  %1755 = vmatmul.msk.f32.vlgmr.msra.gmra.mxu1 %vm290_vm5, %v2090_v29 }
 0x3fd   :  { %1731 = vmatpush.msk.msrb.mxu2 %vm477_vm10, %v540_v45  ;;  %1078 = vmatpush.msrb.mxu3 %v2573_v0  ;;  %v2809_v45 = vld [vmem:[%s3207_s19 + $0x160] sm:$0xff] }
 0x3fe   :  { %1098 = vmatpush.msra.mxu0 %v2578_v1  ;;  %1118 = vmatpush.msrb.mxu1 %v2583_v2 }
 0x3ff   :  { %1079 = vmatpush.msrb.mxu3 %v2595_v4 }
 0x400   :  { %1099 = vmatpush.msra.mxu0 %v2600_v5  ;;  %1119 = vmatpush.msrb.mxu1 %v2607_v6 }
 0x401   :  { %1724 = vmatmul.msk.f32.vlgmr.msra.gmra.mxu2 %vm474_vm11, %v2125_v55  ;;  %1080 = vmatpush.msrb.mxu3 %v2617_v8 }
 0x402   :  { %1739 = vmatpush.msk.msra.mxu2 %vm477_vm10, %v544_v46  ;;  %1100 = vmatpush.msra.mxu0 %v2624_v9  ;;  %v2814_v46 = vld [vmem:[%s3207_s19 + $0x168] sm:$0xff] }
 0x403   :  { %1120 = vmatpush.msrb.mxu1 %v2629_v10  ;;  %1081 = vmatpush.msrb.mxu3 %v2641_v12 }
 0x404   :  { %1101 = vmatpush.msra.mxu0 %v2646_v13 }
 0x405   :  { %1121 = vmatpush.msrb.mxu1 %v2653_v14  ;;  %1082 = vmatpush.msrb.mxu3 %v2669_v16 }
 0x406   :  { %1102 = vmatpush.msra.mxu0 %v2674_v17 }
 0x407   :  { %1122 = vmatpush.msrb.mxu1 %v2679_v19  ;;  %1083 = vmatpush.msrb.mxu3 %v2691_v21 }
 0x408   :  { %1103 = vmatpush.msra.mxu0 %v2696_v22 }
 0x409   :  { %1732 = vmatmul.msk.f32.vlgmr.msrb.gmra.mxu2 %vm474_vm11, %v2125_v55  ;;  %1123 = vmatpush.msrb.mxu1 %v2703_v23 }
 0x40a   :  { %794 = vmatpush.msrb.mxu2 %v197_v47  ;;  %1084 = vmatpush.msrb.mxu3 %v2713_v25 }
 0x40b   :  { %1104 = vmatpush.msra.mxu0 %v2720_v26  ;;  %1124 = vmatpush.msrb.mxu1 %v2725_v28 }
 0x40c   :  { %795 = vmatpush.msrb.mxu2 %v189_v48  ;;  %1085 = vmatpush.msrb.mxu3 %v2741_v31 }
 0x40d   :  { %1105 = vmatpush.msra.mxu0 %v2746_v32  ;;  %1125 = vmatpush.msrb.mxu1 %v2751_v33 }
 0x40e   :  { %796 = vmatpush.msrb.mxu2 %v181_v49  ;;  %1158 = vmatpush.msra.mxu3 %v2763_v36 }
 0x40f   :  { %1178 = vmatpush.msrb.mxu0 %v2768_v37  ;;  %1198 = vmatpush.msra.mxu1 %v2775_v38 }
 0x410   :  { %797 = vmatpush.msrb.mxu2 %v173_v50  ;;  %1159 = vmatpush.msra.mxu3 %v2785_v40 }
 0x411   :  { %1740 = vmatmul.msk.f32.vlgmr.msra.gmra.mxu2 %vm474_vm11, %v2125_v55  ;;  %v193_v55 = vld [vmem:[%s3205_s20 + $0x1b8] sm:$0xff]  ;;  %1179 = vmatpush.msrb.mxu0 %v2792_v41 }
 0x412   :  { %798 = vmatpush.msrb.mxu2 %v165_v52  ;;  %1199 = vmatpush.msra.mxu1 %v2797_v42 }
 0x413   :  { %1160 = vmatpush.msra.mxu3 %v2809_v45  ;;  %1180 = vmatpush.msrb.mxu0 %v2814_v46 }
 0x414   :  { %799 = vmatpush.msrb.mxu2 %v157_v53 }
 0x416   :  { %800 = vmatpush.msrb.mxu2 %v149_v54 }
 0x418   :  { %801 = vmatpush.msrb.mxu2 %v141_v56 }
 0x419   :  { %1744 = vmatmul.msk.f32.vlgmr.msrb.gmra.mxu2 %vm290_vm5, %v2293_v18 }
 0x41a   :  { %874 = vmatpush.msra.mxu2 %v201_v57 }
 0x41c   :  { %875 = vmatpush.msra.mxu2 %v193_v55 }
 0x41e   :  { %876 = vmatpush.msra.mxu2 %v185_v58 }
 0x420   :  { %877 = vmatpush.msra.mxu2 %v177_v59 }
 0x422   :  { %878 = vmatpush.msra.mxu2 %v169_v60 }
 0x424   :  { %879 = vmatpush.msra.mxu2 %v161_v61 }
 0x426   :  { %880 = vmatpush.msra.mxu2 %v153_v62 }
 0x428   :  { %881 = vmatpush.msra.mxu2 %v145_v63 }
 0x429   :  { %1748 = vmatmul.msk.f32.vlgmr.msra.gmra.mxu2 %vm290_vm5, %v2293_v18 }
 0x42a   :  { %957 = vmatpush.msrb.mxu2 %v197_v47  ;;  %v2821_v47 = vld [vmem:[%s3207_s19 + $0x170] sm:$0xff] }
 0x42b   :  { %1200 = vmatpush.msra.mxu1 %v2821_v47 }
 0x42c   :  { %958 = vmatpush.msrb.mxu2 %v189_v48  ;;  %v2826_v48 = vld [vmem:[%s3207_s19 + $0x178] sm:$0xff] }
 0x42e   :  { %959 = vmatpush.msrb.mxu2 %v181_v49  ;;  %v2833_v49 = vld [vmem:[%s3207_s19 + $0x120] sm:$0xff] }
 0x42f   :  { %1161 = vmatpush.msra.mxu3 %v2833_v49 }
 0x430   :  { %960 = vmatpush.msrb.mxu2 %v173_v50  ;;  %v2838_v50 = vld [vmem:[%s3207_s19 + $0x128] sm:$0xff] }
 0x431   :  { %1181 = vmatpush.msrb.mxu0 %v2838_v50 }
 0x432   :  { %961 = vmatpush.msrb.mxu2 %v165_v52  ;;  %v2845_v52 = vld [vmem:[%s3207_s19 + $0x130] sm:$0xff] }
 0x433   :  { %1201 = vmatpush.msra.mxu1 %v2845_v52 }
 0x434   :  { %962 = vmatpush.msrb.mxu2 %v157_v53  ;;  %v2850_v53 = vld [vmem:[%s3207_s19 + $0x138] sm:$0xff] }
 0x436   :  { %963 = vmatpush.msrb.mxu2 %v149_v54  ;;  %v2857_v54 = vld [vmem:[%s3207_s19 + $0xe0] sm:$0xff] }
 0x437   :  { %1162 = vmatpush.msra.mxu3 %v2857_v54 }
 0x438   :  { %964 = vmatpush.msrb.mxu2 %v141_v56  ;;  %v2862_v56 = vld [vmem:[%s3207_s19 + $0xe8] sm:$0xff] }
 0x439   :  { %1752 = vmatmul.msk.f32.vlgmr.msrb.gmra.mxu2 %vm290_vm5, %v2090_v29  ;;  %1182 = vmatpush.msrb.mxu0 %v2862_v56 }
 0x43a   :  { %1037 = vmatpush.msra.mxu2 %v201_v57  ;;  %v2869_v57 = vld [vmem:[%s3207_s19 + $0xf0] sm:$0xff] }
 0x43b   :  { %1202 = vmatpush.msra.mxu1 %v2869_v57 }
 0x43c   :  { %1038 = vmatpush.msra.mxu2 %v193_v55  ;;  %v2874_v55 = vld [vmem:[%s3207_s19 + $0xf8] sm:$0xff] }
 0x43e   :  { %1039 = vmatpush.msra.mxu2 %v185_v58  ;;  %v2881_v58 = vld [vmem:[%s3207_s19 + $0xa0] sm:$0xff] }
 0x43f   :  { %3256 = vst [vmem:[#allocation7_spill] sm:$0xff] %v2881_v58  ;;  %1163 = vmatpush.msra.mxu3 %v2881_v58 }
 0x440   :  { %1040 = vmatpush.msra.mxu2 %v177_v59  ;;  %v2886_v59 = vld [vmem:[%s3207_s19 + $0xa8] sm:$0xff] }
 0x441   :  { %1183 = vmatpush.msrb.mxu0 %v2886_v59 }
 0x442   :  { %1041 = vmatpush.msra.mxu2 %v169_v60  ;;  %v2893_v60 = vld [vmem:[%s3207_s19 + $0xb0] sm:$0xff] }
 0x443   :  { %3257 = vst [vmem:[#allocation8_spill] sm:$0xff] %v2893_v60  ;;  %1203 = vmatpush.msra.mxu1 %v2893_v60 }
 0x444   :  { %1042 = vmatpush.msra.mxu2 %v161_v61  ;;  %v2898_v61 = vld [vmem:[%s3207_s19 + $0xb8] sm:$0xff] }
 0x445   :  { %3258 = vst [vmem:[#allocation9_spill] sm:$0xff] %v2898_v61  ;;  %1204 = vmatpush.msra.mxu1 %v2917_v51 }
 0x446   :  { %1043 = vmatpush.msra.mxu2 %v153_v62  ;;  %v2905_v62 = vld [vmem:[%s3207_s19 + $0x60] sm:$0xff] }
 0x447   :  { %3259 = vst [vmem:[#allocation10_spill] sm:$0xff] %v2905_v62  ;;  %1164 = vmatpush.msra.mxu3 %v2905_v62  ;;  %1205 = vmatpush.msra.mxu1 %v2941_v43  ;;  %v1790_v62 = vld [vmem:[%s3200_s13] ss:$0 sm:$0xff] }
 0x448   :  { %1044 = vmatpush.msra.mxu2 %v145_v63  ;;  %v2910_v63 = vld [vmem:[%s3207_s19 + $0x68] sm:$0xff] }
 0x449   :  { %1756 = vmatmul.msk.f32.vlgmr.msra.gmra.mxu2 %vm290_vm5, %v2090_v29  ;;  %3260 = vst [vmem:[#allocation11_spill] sm:$0xff] %v2910_v63  ;;  %v2934_v29 = vld [vmem:[%s3207_s19 + $0x28] sm:$0xff]  ;;  %1184 = vmatpush.msrb.mxu0 %v2910_v63  ;;  %v428_v63 = vpop.f32.mrf.mxu0 }
 0x44a   :  { %1138 = vmatpush.msrb.mxu2 %v2590_v3  ;;  %1165 = vmatpush.msra.mxu3 %v2929_v27  ;;  %v2957_v58 = vadd.f32 %v1790_v62, %v428_v63  ;;  %v1057_v62 = vld [vmem:[%s3208_s2] sm:$0xff] }
 0x44b   :  { %1185 = vmatpush.msrb.mxu0 %v2934_v29 }
 0x44c   :  { %1139 = vmatpush.msrb.mxu2 %v2612_v7  ;;  %3263 = vst [vmem:[#allocation14_spill] sm:$0xff] %v2957_v58 }
 0x44e   :  { %1140 = vmatpush.msrb.mxu2 %v2634_v11 }
 0x450   :  { %1141 = vmatpush.msrb.mxu2 %v2658_v15 }
 0x452   :  { %1142 = vmatpush.msrb.mxu2 %v2686_v20 }
 0x454   :  { %1143 = vmatpush.msrb.mxu2 %v2708_v24 }
 0x456   :  { %1144 = vmatpush.msrb.mxu2 %v2730_v30 }
 0x458   :  { %1145 = vmatpush.msrb.mxu2 %v2758_v35 }
 0x45a   :  { %1218 = vmatpush.msra.mxu2 %v2780_v39 }
 0x45c   :  { %1219 = vmatpush.msra.mxu2 %v2802_v44 }
 0x45e   :  { %1220 = vmatpush.msra.mxu2 %v2826_v48 }
 0x460   :  { %1221 = vmatpush.msra.mxu2 %v2850_v53 }
 0x462   :  { %1222 = vmatpush.msra.mxu2 %v2874_v55 }
 0x464   :  { %1223 = vmatpush.msra.mxu2 %v2898_v61  ;;  %v2946_v61 = vld [vmem:[%s3207_s19 + $0x38] sm:$0xff] }
 0x465   :  { %3262 = vst [vmem:[#allocation13_spill] sm:$0xff] %v2946_v61 }
 0x466   :  { %1224 = vmatpush.msra.mxu2 %v2922_v34 }
 0x468   :  { %1225 = vmatpush.msra.mxu2 %v2946_v61 }
 0x47c   :  { %v498_v60 = vpop.f32.mrf.mxu2 }
 0x47d   :  { %v1066_v51 = vmul.f32 %v498_v60, %v2957_v58  ;;  %v1248_v58 = vmul.f32 %v2293_v18, %v498_v60  ;;  %v3265_v18 = vld [vmem:[#allocation7_spill] sm:$0xff] }
 0x47f   :  { %1757 = vmatmul.msk.f32.vlgmr.msrb.gmra.mxu3 %vm290_vm5, %v1066_v51  ;;  %1758 = vmatmul.msk.f32.vlgmr.msra.gmra.mxu0 %vm290_vm5, %v1066_v51 }
 0x480   :  { %1759 = vmatmul.msk.f32.vlgmr.msrb.gmra.mxu1 %vm290_vm5, %v1066_v51  ;;  %1760 = vmatmul.msk.f32.vlgmr.msrb.gmra.mxu2 %vm290_vm5, %v1066_v51 }
 0x481   :  { %1286 = vmatpush.xpose.msra.mxu0 %v2578_v1  ;;  %1306 = vmatpush.xpose.msrb.mxu1 %v2583_v2  ;;  %v3267_v2 = vld [vmem:[#allocation11_spill] sm:$0xff] }
 0x482   :  { %1266 = vmatpush.xpose.msrb.mxu3 %v2573_v0  ;;  %1326 = vmatpush.xpose.msrb.mxu2 %v2590_v3  ;;  %v3266_v0 = vld [vmem:[#allocation9_spill] sm:$0xff]  ;;  %v3268_v3 = vld [vmem:[#allocation12_spill] sm:$0xff] }
 0x484   :  { %v523_v63 = vpop.f32.mrf.mxu2 }
 0x485   :  { %v1246_v61 = vmul.f32 %v1057_v62, %v523_v63  ;;  %1287 = vmatpush.xpose.msra.mxu0 %v2600_v5  ;;  %1307 = vmatpush.xpose.msrb.mxu1 %v2607_v6  ;;  %v3270_v5 = vld [vmem:[#allocation13_spill] sm:$0xff]  ;;  %v598_v6 = vpop.f32.mrf.mxu0 }
 0x486   :  { %1267 = vmatpush.xpose.msrb.mxu3 %v2595_v4  ;;  %1327 = vmatpush.xpose.msrb.mxu2 %v2612_v7  ;;  %v3269_v4 = vld [vmem:[#allocation10_spill] sm:$0xff]  ;;  %v618_v7 = vpop.f32.mrf.mxu1 }
 0x487   :  { %v2976_v1 = vadd.f32 %v1248_v58, %v1246_v61  ;;  %1761 = vmatmul.msk.f32.vlgmr.msra.gmra.mxu3 %vm290_vm5, %v1066_v51  ;;  %1762 = vmatmul.msk.f32.vlgmr.msrb.gmra.mxu0 %vm290_vm5, %v1066_v51 }
 0x488   :  { %1763 = vmatmul.msk.f32.vlgmr.msra.gmra.mxu1 %vm290_vm5, %v1066_v51  ;;  %1764 = vmatmul.msk.f32.vlgmr.msra.gmra.mxu2 %vm290_vm5, %v1066_v51  ;;  %v3264_v51 = vld [vmem:[#allocation8_spill] sm:$0xff] }
 0x489   :  { %1288 = vmatpush.xpose.msra.mxu0 %v2624_v9  ;;  %1308 = vmatpush.xpose.msrb.mxu1 %v2629_v10 }
 0x48a   :  { %1268 = vmatpush.xpose.msrb.mxu3 %v2617_v8  ;;  %1328 = vmatpush.xpose.msrb.mxu2 %v2634_v11  ;;  %v578_v8 = vpop.f32.mrf.mxu3 }
 0x48c   :  { %v638_v9 = vpop.f32.mrf.mxu2 }
 0x48d   :  { %1289 = vmatpush.xpose.msra.mxu0 %v2646_v13  ;;  %1309 = vmatpush.xpose.msrb.mxu1 %v2653_v14  ;;  %v678_v10 = vpop.f32.mrf.mxu0 }
 0x48e   :  { %1269 = vmatpush.xpose.msrb.mxu3 %v2641_v12  ;;  %1329 = vmatpush.xpose.msrb.mxu2 %v2658_v15  ;;  %v698_v11 = vpop.f32.mrf.mxu1 }
 0x491   :  { %1290 = vmatpush.xpose.msra.mxu0 %v2674_v17  ;;  %1310 = vmatpush.xpose.msrb.mxu1 %v2679_v19 }
 0x492   :  { %1270 = vmatpush.xpose.msrb.mxu3 %v2669_v16  ;;  %1330 = vmatpush.xpose.msrb.mxu2 %v2686_v20  ;;  %v3038_v12 = vpop.f32.mrf.mxu3 }
 0x494   :  { %v3040_v13 = vpop.f32.mrf.mxu2 }
 0x495   :  { %1291 = vmatpush.xpose.msra.mxu0 %v2696_v22  ;;  %1311 = vmatpush.xpose.msrb.mxu1 %v2703_v23  ;;  %v763_v14 = vpop.f32.mrf.mxu0 }
 0x496   :  { %1271 = vmatpush.xpose.msrb.mxu3 %v2691_v21  ;;  %1331 = vmatpush.xpose.msrb.mxu2 %v2708_v24 }
 0x499   :  { %1292 = vmatpush.xpose.msra.mxu0 %v2720_v26  ;;  %1312 = vmatpush.xpose.msrb.mxu1 %v2725_v28  ;;  %v1051_v28 = vld [vmem:[%s3209_s1 + $0x10] sm:$0xff] }
 0x49a   :  { %1272 = vmatpush.xpose.msrb.mxu3 %v2713_v25  ;;  %1332 = vmatpush.xpose.msrb.mxu2 %v2730_v30  ;;  %v743_v15 = vpop.f32.mrf.mxu3  ;;  %v1050_v25 = vld [vmem:[%s3209_s1 + $0x8] sm:$0xff] }
 0x49d   :  { %1293 = vmatpush.xpose.msra.mxu0 %v2746_v32  ;;  %1313 = vmatpush.xpose.msrb.mxu1 %v2751_v33  ;;  %v843_v16 = vpop.f32.mrf.mxu0  ;;  %v1059_v32 = vmul.f32 %v1050_v25, %v598_v6 }
 0x49e   :  { %1273 = vmatpush.xpose.msrb.mxu3 %v2741_v31  ;;  %1333 = vmatpush.xpose.msrb.mxu2 %v2758_v35 }
 0x4a1   :  { %1366 = vmatpush.xpose.msrb.mxu0 %v2768_v37  ;;  %1386 = vmatpush.xpose.msra.mxu1 %v2775_v38 }
 0x4a2   :  { %1346 = vmatpush.xpose.msra.mxu3 %v2763_v36  ;;  %1406 = vmatpush.xpose.msra.mxu2 %v2780_v39  ;;  %v3042_v17 = vpop.f32.mrf.mxu3  ;;  %v1060_v36 = vmul.f32 %v1051_v28, %v618_v7  ;;  %v1049_v39 = vld [vmem:[%s3209_s1] sm:$0xff] }
 0x4a5   :  { %1367 = vmatpush.xpose.msrb.mxu0 %v2792_v41  ;;  %1387 = vmatpush.xpose.msra.mxu1 %v2797_v42  ;;  %v926_v19 = vpop.f32.mrf.mxu0  ;;  %v1052_v41 = vld [vmem:[%s3209_s1 + $0x18] sm:$0xff] }
 0x4a6   :  { %1347 = vmatpush.xpose.msra.mxu3 %v2785_v40  ;;  %1407 = vmatpush.xpose.msra.mxu2 %v2802_v44 }
 0x4a9   :  { %1368 = vmatpush.xpose.msrb.mxu0 %v2814_v46  ;;  %1388 = vmatpush.xpose.msra.mxu1 %v2821_v47  ;;  %v1058_v47 = vmul.f32 %v1049_v39, %v578_v8 }
 0x4aa   :  { %1348 = vmatpush.xpose.msra.mxu3 %v2809_v45  ;;  %1408 = vmatpush.xpose.msra.mxu2 %v2826_v48  ;;  %v906_v21 = vpop.f32.mrf.mxu3 }
 0x4ad   :  { %1369 = vmatpush.xpose.msrb.mxu0 %v2838_v50  ;;  %1389 = vmatpush.xpose.msra.mxu1 %v2845_v52  ;;  %v1006_v23 = vpop.f32.mrf.mxu0  ;;  %v1061_v52 = vmul.f32 %v1052_v41, %v638_v9 }
 0x4ae   :  { %1349 = vmatpush.xpose.msra.mxu3 %v2833_v49  ;;  %1409 = vmatpush.xpose.msra.mxu2 %v2850_v53 }
 0x4b1   :  { %1370 = vmatpush.xpose.msrb.mxu0 %v2862_v56  ;;  %1390 = vmatpush.xpose.msra.mxu1 %v2869_v57  ;;  %v3271_v56 = vld [vmem:[#allocation6_spill] sm:$0xff] }
 0x4b2   :  { %1350 = vmatpush.xpose.msra.mxu3 %v2857_v54  ;;  %1410 = vmatpush.xpose.msra.mxu2 %v2874_v55  ;;  %v3049_v26 = vpop.f32.mrf.mxu3 }
 0x4b5   :  { %1371 = vmatpush.xpose.msrb.mxu0 %v2886_v59  ;;  %1391 = vmatpush.xpose.msra.mxu1 %v3264_v51 }
 0x4b6   :  { %1351 = vmatpush.xpose.msra.mxu3 %v3265_v18  ;;  %1411 = vmatpush.xpose.msra.mxu2 %v3266_v0 }
 0x4b9   :  { %1372 = vmatpush.xpose.msrb.mxu0 %v3267_v2  ;;  %1392 = vmatpush.xpose.msra.mxu1 %v3268_v3 }
 0x4ba   :  { %1352 = vmatpush.xpose.msra.mxu3 %v3269_v4  ;;  %1412 = vmatpush.xpose.msra.mxu2 %v2922_v34  ;;  %v783_v34 = vpop.f32.mrf.mxu1 }
 0x4bd   :  { %1373 = vmatpush.xpose.msrb.mxu0 %v2934_v29  ;;  %1393 = vmatpush.xpose.msra.mxu1 %v2941_v43  ;;  %v803_v29 = vpop.f32.mrf.mxu2 }
 0x4be   :  { %1353 = vmatpush.xpose.msra.mxu3 %v2929_v27  ;;  %1413 = vmatpush.xpose.msra.mxu2 %v3270_v5 }
 0x4c2   :  { %v863_v43 = vpop.f32.mrf.mxu1 }
 0x4c5   :  { %v3044_v27 = vpop.f32.mrf.mxu2 }
 0x4ca   :  { %v946_v20 = vpop.f32.mrf.mxu1 }
 0x4cd   :  { %v966_v22 = vpop.f32.mrf.mxu2 }
 0x4d2   :  { %v1026_v24 = vpop.f32.mrf.mxu1 }
 0x4d5   :  { %v3054_v30 = vpop.f32.mrf.mxu2 }
 0x4fc   :  { %v1107_v31 = vpop.f32.mrf.mxu0 }
 0x4fd   :  { %v1231_v33 = vmul.f32 %v1107_v31, %v763_v14  ;;  %v1127_v35 = vpop.f32.mrf.mxu1 }
 0x4fe   :  { %v1232_v37 = vmul.f32 %v1127_v35, %v783_v34 }
 0x4ff   :  { %v1239_v38 = vadd.f32 %v1231_v33, %v1059_v32 }
 0x500   :  { %v1240_v40 = vadd.f32 %v1232_v37, %v1060_v36 }
 0x501   :  { %v1251_v42 = vmul.f32 %v1239_v38, %v926_v19  ;;  %1701 = vst [vmem:[%s3210_s23 + $0x8] sm:$0xff] %v1239_v38 }
 0x502   :  { %v1252_v45 = vmul.f32 %v1240_v40, %v946_v20  ;;  %v1087_v46 = vpop.f32.mrf.mxu3 }
 0x503   :  { %v1230_v49 = vmul.f32 %v1087_v46, %v743_v15  ;;  %v1147_v50 = vpop.f32.mrf.mxu2  ;;  %1294 = vmatmul.f32.vlgmr.msra.gmra.mxu0 %v1251_v42 }
 0x504   :  { %v1233_v53 = vmul.f32 %v1147_v50, %v803_v29  ;;  %1314 = vmatmul.f32.vlgmr.msrb.gmra.mxu1 %v1252_v45  ;;  %v1187_v54 = vpop.f32.mrf.mxu0  ;;  %1767 = vmatpush.msk.msra.mxu0 %vm477_vm10, %v3271_v56 }
 0x505   :  { %v1238_v55 = vadd.f32 %v1230_v49, %v1058_v47  ;;  %v1235_v58 = vmul.f32 %v1187_v54, %v843_v16  ;;  %v1207_v59 = vpop.f32.mrf.mxu1  ;;  %1769 = vmatpush.xpose.msk.msrb.mxu1 %vm290_vm5, %v3271_v56  ;;  %v3273_v47 = vld [vmem:[#allocation14_spill] sm:$0xff] }
 0x506   :  { %v1241_v61 = vadd.f32 %v1233_v53, %v1061_v52  ;;  %v1236_v62 = vmul.f32 %v1207_v59, %v863_v43 }
 0x507   :  { %v1250_v63 = vmul.f32 %v1238_v55, %v906_v21 }
 0x508   :  { %v1054_v44 = vld [vmem:[%s3209_s1 + $0x28] sm:$0xff]  ;;  %v1253_v0 = vmul.f32 %v1241_v61, %v966_v22 }
 0x509   :  { %1702 = vst [vmem:[%s3210_s23 + $0x10] sm:$0xff] %v1240_v40  ;;  %v1063_v57 = vmul.f32 %v1054_v44, %v678_v10  ;;  %1274 = vmatmul.f32.vlgmr.msrb.gmra.mxu3 %v1250_v63 }
 0x50a   :  { %1334 = vmatmul.f32.vlgmr.msrb.gmra.mxu2 %v1253_v0  ;;  %v1167_v6 = vpop.f32.mrf.mxu3  ;;  %1765 = vmatpush.xpose.msk.msrb.mxu3 %vm290_vm5, %v3271_v56 }
 0x50b   :  { %v1243_v51 = vadd.f32 %v1235_v58, %v1063_v57  ;;  %v1234_v8 = vmul.f32 %v1167_v6, %v3042_v17  ;;  %v1227_v9 = vpop.f32.mrf.mxu2  ;;  %1771 = vmatpush.msk.msrb.mxu2 %vm477_vm10, %v3271_v56 }
 0x50d   :  { %v1255_v4 = vmul.f32 %v1243_v51, %v1006_v23 }
 0x50f   :  { %1374 = vmatmul.f32.vlgmr.msrb.gmra.mxu0 %v1255_v4 }
 0x510   :  { %v1055_v48 = vld [vmem:[%s3209_s1 + $0x30] sm:$0xff]  ;;  %1775 = vmatpush.msk.msrb.mxu0 %vm477_vm10, %v3271_v56 }
 0x511   :  { %v1064_v60 = vmul.f32 %v1055_v48, %v698_v11  ;;  %1700 = vst [vmem:[%s3210_s23] sm:$0xff] %v1238_v55  ;;  %v1237_v11 = vmul.f32 %v1227_v9, %v3044_v27  ;;  %v453_v48 = vsub.f32 0.0, %v3273_v47  ;;  %v1791_v9 = vld [vmem:[%s3211_s15] ss:$0 sm:$0xff] }
 0x513   :  { %v1244_v2 = vadd.f32 %v1236_v62, %v1064_v60  ;;  %v454_v49 = vmul.f32 1.442695, %v453_v48 }
 0x515   :  { %v1256_v5 = vmul.f32 %v1244_v2, %v1026_v24 }
 0x517   :  { %1394 = vmatmul.f32.vlgmr.msra.gmra.mxu1 %v1256_v5 }
 0x518   :  { %v1053_v18 = vld [vmem:[%s3209_s1 + $0x20] sm:$0xff] }
 0x519   :  { %1703 = vst [vmem:[%s3210_s23 + $0x18] sm:$0xff] %v1241_v61  ;;  %v1062_v7 = vmul.f32 %v1053_v18, %v3038_v12 }
 0x51b   :  { %v1242_v14 = vadd.f32 %v1234_v8, %v1062_v7 }
 0x51d   :  { %v1254_v15 = vmul.f32 %v1242_v14, %v3049_v26 }
 0x51f   :  { %1354 = vmatmul.f32.vlgmr.msra.gmra.mxu3 %v1254_v15 }
 0x520   :  { %v1056_v3 = vld [vmem:[%s3209_s1 + $0x38] sm:$0xff]  ;;  %1773 = vmatpush.xpose.msk.msra.mxu3 %vm290_vm5, %v3271_v56 }
 0x521   :  { %1705 = vst [vmem:[%s3210_s23 + $0x28] sm:$0xff] %v1243_v51  ;;  %v1065_v10 = vmul.f32 %v1056_v3, %v3040_v13  ;;  %v3272_v13 = vld [vmem:[#allocation4_spill] sm:$0xff] }
 0x522   :  { %1706 = vst [vmem:[%s3210_s23 + $0x30] sm:$0xff] %v1244_v2  ;;  %v1418_v29 = vmul.f32 %v2976_v1, %v3272_v13 }
 0x523   :  { %v1245_v34 = vadd.f32 %v1237_v11, %v1065_v10  ;;  %1704 = vst [vmem:[%s3210_s23 + $0x20] sm:$0xff] %v1242_v14 }
 0x525   :  { %v1257_v12 = vmul.f32 %v1245_v34, %v3054_v30  ;;  %1707 = vst [vmem:[%s3210_s23 + $0x38] sm:$0xff] %v1245_v34 }
 0x527   :  { %1414 = vmatmul.f32.vlgmr.msra.gmra.mxu2 %v1257_v12  ;;  %1766 = vmatmul.msk.f32.vlgmr.msrb.gmra.mxu3 %vm290_vm5, %v1418_v29 }
 0x580   :  { %v1295_v16 = vpop.f32.mrf.mxu0 }
 0x581   :  { %v1315_v27 = vpop.f32.mrf.mxu1 }
 0x58c   :  { %v1275_v43 = vpop.f32.mrf.mxu3  ;;  %v1375_v24 = vpop.f32.mrf.mxu0 }
 0x58d   :  { %v1296_v17 = vadd.f32 %v1295_v16, %v1275_v43  ;;  %v1335_v20 = vpop.f32.mrf.mxu2 }
 0x58f   :  { %v1316_v19 = vadd.f32 %v1315_v27, %v1296_v17 }
 0x591   :  { %v1336_v21 = vadd.f32 %v1335_v20, %v1316_v19  ;;  %v3274_v19 = vld [vmem:[#allocation3_spill] sm:$0xff]  ;;  %v3275_v20 = vld [vmem:[#allocation5_spill] sm:$0xff] }
 0x594   :  { %v1395_v26 = vpop.f32.mrf.mxu1 }
 0x5a2   :  { %v1355_v22 = vpop.f32.mrf.mxu3 }
 0x5a3   :  { %v1356_v23 = vadd.f32 %v1355_v22, %v1336_v21  ;;  %v3276_v21 = vld [vmem:[#allocation2_spill] sm:$0xff] }
 0x5a4   :  { %v1630_v22 = vsub.f32 0.0, %v3276_v21 }
 0x5a5   :  { %v1376_v25 = vadd.f32 %v1375_v24, %v1356_v23 }
 0x5a6   :  { %v1631_v23 = vmul.f32 1.442695, %v1630_v22 }
 0x5a7   :  { %v1396_v28 = vadd.f32 %v1395_v26, %v1376_v25 }
 0x5aa   :  { %v1415_v30 = vpop.f32.mrf.mxu2  ;;  %v1441_v32 = vpop.f32.mrf.mxu3 }
 0x5ab   :  { %v1416_v31 = vadd.f32 %v1415_v30, %v1396_v28  ;;  %v1444_v33 = vmax.f32 %v1441_v32, 1.0  ;;  %v1657_v28 = vld [vmem:[%s3213_s16 + $0x38] sm:$0xff]  ;;  %v1656_v30 = vld [vmem:[%s3213_s16 + $0x30] sm:$0xff] }
 0x5ac   :  { %1675 = vmatpush.msra.mxu1 %v1657_v28 }
 0x5ad   :  { %1460 = vrot.lane.b32.xlu2 %v1416_v31, %s1822_s6  ;;  %1806 = vrcp.f32 %v1444_v33  ;;  %v1456_v38 = vand.u32 2147483648, %v1444_v33  ;;  %v1454_v40 = vand.u32 2147483647, %v1444_v33  ;;  %vm1450_vm13 = vweird.f32 %v1444_v33  ;;  %v1655_v31 = vld [vmem:[%s3213_s16 + $0x28] sm:$0xff] }
 0x5ae   :  { %1808 = vpow2.f32 %v454_v49  ;;  %1676 = vmatpush.msra.mxu1 %v1656_v30 }
 0x5af   :  { %v1457_v42 = vor.u32 1.1754944e-38, %v1456_v38  ;;  %vm1455_vm15 = vcmp.eq.f32.partialorder %v1454_v40, 8.507059e+37  ;;  %v1651_v38 = vld [vmem:[%s3213_s16 + $0x8] sm:$0xff]  ;;  %v1650_v40 = vld [vmem:[%s3213_s16] sm:$0xff] }
 0x5b0   :  { %1677 = vmatpush.msra.mxu1 %v1655_v31 }
 0x5b3   :  { %v1807_v35 = vpop.eup %1806 }
 0x5b4   :  { %v1446_v36 = vmul.f32 %v1807_v35, %v1444_v33  ;;  %vm1451_vm12 = vweird.f32 %v1807_v35  ;;  %v1809_v50 = vpop.eup %1808  ;;  %v1654_v33 = vld [vmem:[%s3213_s16 + $0x20] sm:$0xff] }
 0x5b5   :  { %vm1452_vm14 = vmor %vm1450_vm13, %vm1451_vm12  ;;  %v456_v52 = vadd.f32 1.0, %v1809_v50  ;;  %1678 = vmatpush.msra.mxu1 %v1654_v33  ;;  %vm1693_vm13 = vcmask 785664  }
 0x5b6   :  { %v1447_v37 = vsub.f32 1.0, %v1446_v36 }
 0x5b7   :  { %1810 = vrcp.f32 %v456_v52  ;;  %v468_v58 = vand.u32 2147483648, %v456_v52  ;;  %vm462_vm2 = vweird.f32 %v456_v52  ;;  %v466_v59 = vand.u32 2147483647, %v456_v52 }
 0x5b8   :  { %v1448_v39 = vmul.f32 %v1807_v35, %v1447_v37  ;;  %v1652_v37 = vld [vmem:[%s3213_s16 + $0x10] sm:$0xff] }
 0x5b9   :  { %v469_v61 = vor.u32 1.1754944e-38, %v468_v58  ;;  %vm467_vm4 = vcmp.eq.f32.partialorder %v466_v59, 8.507059e+37 }
 0x5ba   :  { %v1449_v41 = vadd.f32 %v1807_v35, %v1448_v39 }
 0x5bc   :  { %v1453_v44 = vsel %vm1452_vm14, %v1807_v35, %v1449_v41  ;;  %v1653_v35 = vld [vmem:[%s3213_s16 + $0x18] sm:$0xff]  ;;  %vm1698_vm14 = vcmask 818944  }
 0x5bd   :  { %v1458_v45 = vsel %vm1455_vm15, %v1457_v42, %v1453_v44  ;;  %v1811_v53 = vpop.eup %1810  ;;  %1679 = vmatpush.msra.mxu1 %v1653_v35 }
 0x5be   :  { %1768 = vmatmul.msk.f32.vlgmr.msra.gmra.mxu0 %vm474_vm11, %v1458_v45  ;;  %v458_v54 = vmul.f32 %v1811_v53, %v456_v52  ;;  %vm463_vm1 = vweird.f32 %v1811_v53 }
 0x5bf   :  { %vm464_vm3 = vmor %vm462_vm2, %vm463_vm1  ;;  %1680 = vmatpush.msra.mxu1 %v1652_v37 }
 0x5c0   :  { %v459_v56 = vsub.f32 1.0, %v458_v54 }
 0x5c1   :  { %1681 = vmatpush.msra.mxu1 %v1651_v38 }
 0x5c2   :  { %v460_v57 = vmul.f32 %v1811_v53, %v459_v56 }
 0x5c3   :  { %1682 = vmatpush.msra.mxu1 %v1650_v40 }
 0x5c4   :  { %v461_v55 = vadd.f32 %v1811_v53, %v460_v57 }
 0x5c6   :  { %v465_v60 = vsel %vm464_vm3, %v1811_v53, %v461_v55 }
 0x5c7   :  { %v470_v63 = vsel %vm467_vm4, %v469_v61, %v465_v60  ;;  %v1793_v60 = vld [vmem:[%s3214_s17] ss:$0 sm:$0xff] }
 0x607   :  { %v1461_v62 = vpop.permute.xlu2 %1460 }
 0x608   :  { %v1463_v51 = vmul.f32 %v1461_v62, %v470_v63  ;;  %v1818_v63 = vld [vmem:[%s3243_s24] sm:$0xff] }
 0x63b   :  { %v1484_v46 = vpop.f32.mrf.mxu0 }
 0x63c   :  { %1488 = vrot.lane.b32.xlu1 %v1484_v46, %s1822_s6 }
 0x6ae   :  { %v1489_v18 = vpop.permute.xlu1 %1488 }
 0x6af   :  { %v1491_v0 = vmul.f32 %v1489_v18, %v1463_v51 }
 0x6b1   :  { %1493 = vrot.lane.b32.xlu2 %v1491_v0, %s1822_s6 }
 0x70b   :  { %v1494_v2 = vpop.permute.xlu2 %1493 }
 0x70c   :  { %1770 = vmatmul.msk.f32.vlgmr.msrb.gmra.mxu1 %vm290_vm5, %v1494_v2 }
 0x789   :  { %v1514_v3 = vpop.f32.mrf.mxu1 }
 0x78a   :  { %v1517_v4 = vmul.f32 0.0625, %v1514_v3 }
 0x78c   :  { %1772 = vmatmul.msk.f32.vlgmr.msrb.gmra.mxu2 %vm474_vm11, %v1517_v4 }
 0x80f   :  { %v1538_v5 = vpop.f32.mrf.mxu2 }
 0x810   :  { %1542 = vrot.lane.b32.xlu1 %v1538_v5, %s1822_s6 }
 0x882   :  { %v1543_v6 = vpop.permute.xlu1 %1542 }
 0x883   :  { %v3127_v7 = vsub.f32 %v1491_v0, %v1543_v6 }
 0x885   :  { %v1546_v8 = vmul.f32 %v3127_v7, %v3127_v7 }
 0x887   :  { %1548 = vrot.lane.b32.xlu2 %v1546_v8, %s1822_s6 }
 0x88f   :  { %1622 = vrot.lane.b32.xlu2 %v1791_v9, %s1822_s6 }
 0x897   :  { %1690 = vrot.lane.b32.xlu2 %v2976_v1, %s1825_s5  ;;  %v1792_v1 = vld [vmem:[%s3212_s14] ss:$0 sm:$0xff] }
 0x898   :  { %1615 = vrot.lane.b32.xlu1 %v1792_v1, %s1822_s6 }
 0x8e1   :  { %v1549_v10 = vpop.permute.xlu2 %1548 }
 0x8e2   :  { %1774 = vmatmul.msk.f32.vlgmr.msra.gmra.mxu3 %vm290_vm5, %v1549_v10 }
 0x8e9   :  { %v1623_v52 = vpop.permute.xlu2 %1622 }
 0x8f1   :  { %v1691_v18 = vpop.permute.xlu2 %1690 }
 0x90a   :  { %v1616_v44 = vpop.permute.xlu1 %1615 }
 0x965   :  { %v1569_v11 = vpop.f32.mrf.mxu3 }
 0x966   :  { %v1572_v14 = vmul.f32 0.0625, %v1569_v11 }
 0x968   :  { %v1573_v34 = vadd.f32 1e-05, %v1572_v14 }
 0x96a   :  { %1812 = vrsqrt.f32 %v1573_v34  ;;  %vm1580_vm7 = vweird.f32 %v1573_v34 }
 0x96b   :  { %1814 = vpow2.f32 %v1631_v23 }
 0x970   :  { %v1813_v15 = vpop.eup %1812 }
 0x971   :  { %v1575_v12 = vmul.f32 %v1813_v15, %v1573_v34  ;;  %vm1581_vm6 = vweird.f32 %v1813_v15  ;;  %v1815_v24 = vpop.eup %1814 }
 0x972   :  { %vm1582_vm8 = vmor %vm1580_vm7, %vm1581_vm6  ;;  %v1633_v25 = vadd.f32 1.0, %v1815_v24 }
 0x973   :  { %v1576_v13 = vmul.f32 %v1813_v15, %v1575_v12 }
 0x974   :  { %1816 = vrcp.f32 %v1633_v25  ;;  %v1645_v45 = vand.u32 2147483648, %v1633_v25  ;;  %vm1639_vm10 = vweird.f32 %v1633_v25  ;;  %v1643_v47 = vand.u32 2147483647, %v1633_v25 }
 0x975   :  { %v1577_v29 = vmul.f32 0.5, %v1576_v13 }
 0x976   :  { %v1646_v50 = vor.u32 1.1754944e-38, %v1645_v45  ;;  %vm1644_vm12 = vcmp.eq.f32.partialorder %v1643_v47, 8.507059e+37 }
 0x977   :  { %v1578_v16 = vsub.f32 1.5, %v1577_v29 }
 0x979   :  { %v1579_v43 = vmul.f32 %v1813_v15, %v1578_v16 }
 0x97a   :  { %v1817_v26 = vpop.eup %1816 }
 0x97b   :  { %v1583_v17 = vsel %vm1582_vm8, %v1813_v15, %v1579_v43  ;;  %v1635_v32 = vmul.f32 %v1817_v26, %v1633_v25  ;;  %vm1640_vm9 = vweird.f32 %v1817_v26 }
 0x97c   :  { %1776 = vmatmul.msk.f32.vlgmr.msrb.gmra.mxu0 %vm474_vm11, %v1583_v17  ;;  %vm1641_vm11 = vmor %vm1639_vm10, %vm1640_vm9 }
 0x97d   :  { %v1636_v36 = vsub.f32 1.0, %v1635_v32 }
 0x97f   :  { %v1637_v39 = vmul.f32 %v1817_v26, %v1636_v36 }
 0x981   :  { %v1638_v41 = vadd.f32 %v1817_v26, %v1637_v39 }
 0x983   :  { %v1642_v49 = vsel %vm1641_vm11, %v1817_v26, %v1638_v41 }
 0x984   :  { %v1647_v53 = vsel %vm1644_vm12, %v1646_v50, %v1642_v49 }
 0x985   :  { %v1648_v57 = vmul.f32 %v1647_v53, %v3276_v21 }
 0x9f9   :  { %v1604_v27 = vpop.f32.mrf.mxu0 }
 0x9fa   :  { %1608 = vrot.lane.b32.xlu0 %v1604_v27, %s1822_s6 }
 0xa02   :  { %1626 = vrot.lane.b32.xlu0 %v3274_v19, %s1822_s6 }
 0xa0a   :  { %1695 = vrot.lane.b32.xlu0 %v3275_v20, %s1826_s4 }
 0xa6c   :  { %v1609_v42 = vpop.permute.xlu0 %1608 }
 0xa6d   :  { %v1611_v46 = vmul.f32 %v1609_v42, %v3127_v7 }
 0xa6f   :  { %v1618_v48 = vmul.f32 %v1616_v44, %v1611_v46 }
 0xa71   :  { %v1625_v54 = vadd.f32 %v1623_v52, %v1618_v48 }
 0xa74   :  { %v1627_v56 = vpop.permute.xlu0 %1626 }
 0xa75   :  { %v1629_v55 = vadd.f32 %v1627_v56, %v1625_v54 }
 0xa77   :  { %v1649_v58 = vmul.f32 %v1648_v57, %v1629_v55 }
 0xa79   :  { %1663 = vrot.lane.b32.xlu1 %v1649_v58, %s1822_s6 }
 0xa7c   :  { %v1696_v0 = vpop.permute.xlu0 %1695 }
 0xaeb   :  { %v1664_v59 = vpop.permute.xlu1 %1663 }
 0xaec   :  { %1777 = vmatmul.msk.f32.vlgmr.msra.gmra.mxu1 %vm290_vm5, %v1664_v59 }
 0xb69   :  { %v1684_v61 = vpop.f32.mrf.mxu1 }
 0xb6a   :  { %v1685_v62 = vadd.f32 %v1793_v60, %v1684_v61 }
 0xb6c   :  { %v1687_v51 = vadd.f32 %v1818_v63, %v1685_v62 }
 0xb6e   :  { %1688 = vst.msk [vmem:[%s3215_s22] sm:$0xff] %vm207_vm0, %v1687_v51 }
 0xb6f   :  { %1694 = vst.msk [vmem:[%s3215_s22] sm:$0xff] %vm1693_vm13, %v1691_v18 }
 0xb70   :  { %1699 = vst.msk [vmem:[%s3215_s22] sm:$0xff] %vm1698_vm14, %v1696_v0 }

</bundles_post_ra>
